<compile_context>
chip_gen: v6e
topology: v6e:2x2x1
jax: 0.10.0
libtpu: 0.0.40
codegen_flags: <defaults>
</compile_context>

<pallas_src>
import functools

import jax
import jax.numpy as jnp
import numpy as np
from jax.experimental import pallas as pl
from jax.experimental.pallas import tpu as pltpu


# -----------------------------------------------------------------------------
# Pallas kernel: full per-token pipeline (phis -> gated attention over clusters
# -> softmax pooling -> rho) for a tile of T tokens.
# -----------------------------------------------------------------------------
def deepattnmisl_kernel(
    x_ref,        # (T, M)      bf16  (pre-cast in the wrapper)
    w1_ref,       # (M, K*H)    bf16  fused phi layer-1 weights
    b1_ref,       # (1, K*H)    f32
    w2_ref,       # (K, H, H)   bf16  per-cluster phi layer-2 weights
    b2_ref,       # (K, 1, H)   f32
    wa_ref,       # (H, H)      bf16  attention_net first Linear
    ba_ref,       # (1, H)      f32
    wab_ref,      # (H, 2*D)    bf16  [attention_a | attention_b] fused
    bab_ref,      # (1, 2*D)    f32
    wc_ref,       # (1, D)      f32   attention_c Linear (n_classes=1), as a row
    bc_ref,       # (1, 1)      f32
    wr_ref,       # (H, M)      bf16  rho Linear
    br_ref,       # (1, M)      f32
    out_ref,      # (T, M)      f32
):
    K, H, _ = w2_ref.shape
    D = wc_ref.shape[1]
    bf16 = jnp.bfloat16

    x = x_ref[...]                                                   # (T, M) bf16

    # --- phi layer 1: one wide MXU matmul over all clusters -------------------
    h1_all = jnp.dot(x, w1_ref[...],
                     preferred_element_type=jnp.float32) + b1_ref[...]
    h1_all = jnp.maximum(h1_all, 0.0)                                # (T, K*H) f32

    # --- per-cluster pipeline: phi layer 2 -> shared attention Linear ->
    #     fused gated-attention branches -> scalar score.  K is static, so the
    #     Python loop unrolls; all slices are lane-aligned (H multiple of 128).
    ha_list = []
    score_list = []
    for k in range(K):
        h1_k = h1_all[:, k * H:(k + 1) * H]                          # (T, H)
        h2_k = jnp.maximum(
            jnp.dot(h1_k.astype(bf16), w2_ref[k],
                    preferred_element_type=jnp.float32) + b2_ref[k], 0.0)
        ha_k = jnp.maximum(
            jnp.dot(h2_k.astype(bf16), wa_ref[...],
                    preferred_element_type=jnp.float32) + ba_ref[...], 0.0)
        ab_k = jnp.dot(ha_k.astype(bf16), wab_ref[...],
                       preferred_element_type=jnp.float32) + bab_ref[...]
        gated = jnp.tanh(ab_k[:, :D]) * jax.nn.sigmoid(ab_k[:, D:])  # (T, D)
        s_k = jnp.sum(gated * wc_ref[...], axis=-1, keepdims=True) + bc_ref[...]
        ha_list.append(ha_k)                                          # (T, H)
        score_list.append(s_k)                                        # (T, 1)

    # --- softmax over the cluster axis + attention-weighted pooling ------------
    m_max = score_list[0]
    for k in range(1, K):
        m_max = jnp.maximum(m_max, score_list[k])
    exps = [jnp.exp(s - m_max) for s in score_list]
    denom = exps[0]
    for k in range(1, K):
        denom = denom + exps[k]
    inv_denom = pl.reciprocal(denom, approx=True)                    # EUP slot

    pooled = (exps[0] * inv_denom) * ha_list[0]
    for k in range(1, K):
        pooled = pooled + (exps[k] * inv_denom) * ha_list[k]         # (T, H)

    # --- rho: Linear -> ReLU ----------------------------------------------------
    out = jnp.maximum(
        jnp.dot(pooled.astype(bf16), wr_ref[...],
                preferred_element_type=jnp.float32) + br_ref[...], 0.0)
    out_ref[...] = out.astype(out_ref.dtype)


# -----------------------------------------------------------------------------
# Wrapper
# -----------------------------------------------------------------------------
def _full_spec(arr):
    nd = arr.ndim
    return pl.BlockSpec(arr.shape, lambda i, _nd=nd: (0,) * _nd)


def _round_up(v, m):
    return -(-v // m) * m


@functools.lru_cache(maxsize=1)
def _has_two_tensorcores():
    """True only on chips with 2 TensorCores per chip (v7x); best-effort."""
    try:
        kind = getattr(jax.devices()[0], "device_kind", "") or ""
        kind = kind.lower()
        return ("v7" in kind) or ("7x" in kind)
    except Exception:
        return False


@functools.partial(jax.jit, static_argnames=("token_tile",))
def deepattnmisl_forward(x, params, *, token_tile=512):
    """x: (1, n1, M) float32.  Returns (1, n1, M) float32."""
    batch, n1, m = x.shape
    assert batch == 1, "module's squeeze(0)/bmm path assumes batch_size == 1"

    K, m_in, H = params["w1"].shape
    assert m_in == m
    D = params["wta"].shape[1]

    # --- tile sizing -----------------------------------------------------------
    # token_tile is the main tuning knob (512-1024 keeps the MXU full and
    # amortizes the ~0.35 us per-grid-step overhead).  For small n1:
    #   * single-TC chips (v5e/v6e): ONE grid step with T = round_up(n1, 16)
    #     (the grid is a serial loop there, splitting only adds overhead);
    #   * v7x (2 TCs/chip): shrink T so the parallel grid has >= 2 steps.
    # T must be a multiple of 16 because x is pre-cast to bf16 (sublane packing).
    T = token_tile
    assert T % 16 == 0, "token_tile must be a multiple of 16 (bf16 sublane packing)"
    if n1 <= T:
        if _has_two_tensorcores():
            T = max(16, _round_up(-(-n1 // 2), 16))
        else:
            T = max(16, _round_up(n1, 16))
    num_tiles = -(-n1 // T)
    n_pad = num_tiles * T

    # Pre-cast x to bf16 (numerically identical to the in-kernel cast, but
    # halves x DMA bytes and removes a (T, M) VPU pack per grid step).
    x2 = x.reshape(n1, m).astype(jnp.bfloat16)
    if n_pad != n1:
        # Zero-pad ragged token counts; padded rows are discarded below.
        x2 = jnp.pad(x2, ((0, n_pad - n1), (0, 0)))

    bf16 = jnp.bfloat16
    # phi layer-1 weights fused into one (M, K*H) operand; layout such that
    # columns [k*H:(k+1)*H] == w1[k].
    w1cat = jnp.transpose(params["w1"], (1, 0, 2)).reshape(m, K * H).astype(bf16)
    b1cat = jnp.transpose(params["b1"], (1, 0, 2)).reshape(1, K * H)
    w2 = params["w2"].astype(bf16)
    b2 = params["b2"]
    wa = params["wa"].astype(bf16)
    ba = params["ba"]
    # gated-attention branches fused into one (H, 2D) operand: [wta | wtb]
    wab = jnp.concatenate([params["wta"], params["wtb"]], axis=1).astype(bf16)
    bab = jnp.concatenate([params["bta"], params["btb"]], axis=1)
    wc = params["wc"]
    bc = params["bc"]
    wr = params["wr"].astype(bf16)
    br = params["br"]

    ordered = [w1cat, b1cat, w2, b2, wa, ba, wab, bab, wc, bc, wr, br]

    in_specs = [pl.BlockSpec((T, m), lambda i: (i, 0))]
    # Weights/biases are grid-invariant (constant index_map): the pipeline keeps
    # them resident and skips re-DMA after the first step.  At these sizes the
    # default double-buffer is noise; per-tile activation intermediates (a few
    # (T, K*H)/(T, H) f32 slabs) stay under the default scoped-VMEM limits for
    # T <= 1024.
    in_specs += [_full_spec(p) for p in ordered]

    # Advisory cost estimate so XLA schedules ops around the custom call well.
    flops = 2 * n_pad * (m * K * H + K * H * H + K * H * H + K * H * 2 * D + H * m)
    transcendentals = n_pad * K * (2 * D + 1) + n_pad
    weight_bytes = sum(int(p.size) * p.dtype.itemsize for p in ordered)
    bytes_accessed = n_pad * m * 2 + n_pad * m * 4 + weight_bytes

    out = pl.pallas_call(
        deepattnmisl_kernel,
        out_shape=jax.ShapeDtypeStruct((n_pad, m), jnp.float32),
        grid=(num_tiles,),
        in_specs=in_specs,
        out_specs=pl.BlockSpec((T, m), lambda i: (i, 0)),
        compiler_params=pltpu.CompilerParams(
            dimension_semantics=("parallel",)),
        cost_estimate=pl.CostEstimate(
            flops=int(flops),
            transcendentals=int(transcendentals),
            bytes_accessed=int(bytes_accessed)),
    )(x2, *ordered)

    return out[:n1].reshape(1, n1, m)


# -----------------------------------------------------------------------------
# Deterministic parameter init (synthetic; matches module layer shapes)
# -----------------------------------------------------------------------------
def init_params(key, input_dim, hidden, attn_dim, num_clusters):
    ks = jax.random.split(key, 16)
    s = 0.05
    f32 = jnp.float32
    return {
        # phis (per-cluster two Linear layers), stored (in, out)
        "w1": jax.random.normal(ks[0], (num_clusters, input_dim, hidden), f32) * s,
        "b1": jax.random.normal(ks[1], (num_clusters, 1, hidden), f32) * s,
        "w2": jax.random.normal(ks[2], (num_clusters, hidden, hidden), f32) * s,
        "b2": jax.random.normal(ks[3], (num_clusters, 1, hidden), f32) * s,
        # attention_net first Linear
        "wa": jax.random.normal(ks[4], (hidden, hidden), f32) * s,
        "ba": jax.random.normal(ks[5], (1, hidden), f32) * s,
        # Attn_Net_Gated branches
        "wta": jax.random.normal(ks[6], (hidden, attn_dim), f32) * s,
        "bta": jax.random.normal(ks[7], (1, attn_dim), f32) * s,
        "wtb": jax.random.normal(ks[8], (hidden, attn_dim), f32) * s,
        "btb": jax.random.normal(ks[9], (1, attn_dim), f32) * s,
        "wc": jax.random.normal(ks[10], (1, attn_dim), f32) * s,
        "bc": jax.random.normal(ks[11], (1, 1), f32) * s,
        # rho
        "wr": jax.random.normal(ks[12], (hidden, input_dim), f32) * s,
        "br": jax.random.normal(ks[13], (1, input_dim), f32) * s,
    }


# -----------------------------------------------------------------------------
# Pure-JAX reference (mirrors the PyTorch forward, batch_size=1, eval mode)
# -----------------------------------------------------------------------------
def reference_forward(x, params):
    batch, n1, m = x.shape
    xf = x.reshape(-1, m)
    h_att = []
    scores = []
    num_clusters = params["w1"].shape[0]
    for k in range(num_clusters):
        h1 = jax.nn.relu(xf @ params["w1"][k] + params["b1"][k])
        h2 = jax.nn.relu(h1 @ params["w2"][k] + params["b2"][k])
        ha = jax.nn.relu(h2 @ params["wa"] + params["ba"])
        a = jnp.tanh(ha @ params["wta"] + params["bta"])
        b = jax.nn.sigmoid(ha @ params["wtb"] + params["btb"])
        s = jnp.sum((a * b) * params["wc"], axis=-1, keepdims=True) + params["bc"]
        h_att.append(ha)
        scores.append(s)
    h = jnp.stack(h_att, axis=1)                      # (n1, K, H)
    A = jnp.concatenate(scores, axis=-1)[:, None, :]  # (n1, 1, K)
    A = jax.nn.softmax(A, axis=-1)
    pooled = jnp.einsum("nok,nkh->noh", A, h)[:, 0, :]   # (n1, H)
    out = jax.nn.relu(pooled @ params["wr"] + params["br"])
    return out.reshape(batch, n1, m)


if __name__ == "__main__":
    # Small shapes consistent with the module: batch=1 (required by the
    # squeeze(0)/bmm path), n1=24 patches (not a multiple of 16, so the padding
    # path is exercised; auto tile-sizing picks 1 step on v5e/v6e, 2 on v7x),
    # input_dim=M=128, hidden=128, attn_dim=128, num_clusters=4.
    BATCH, N1, M, H, D, K = 1, 24, 128, 128, 128, 4

    key = jax.random.PRNGKey(0)
    kx, kp = jax.random.split(key)
    x = jax.random.normal(kx, (BATCH, N1, M), jnp.float32)
    params = init_params(kp, input_dim=M, hidden=H, attn_dim=D, num_clusters=K)

    out = deepattnmisl_forward(x, params)      # default token_tile; auto-sized
    out = jax.block_until_ready(out)

    ref = jax.block_until_ready(reference_forward(x, params))
    assert out.shape == (BATCH, N1, M)
    # bf16 matmul operands (f32 accumulation) => slightly looser tolerance.
    np.testing.assert_allclose(np.asarray(out), np.asarray(ref), rtol=2e-2, atol=2e-2)

    print("KERNEL_OK")
</pallas_src>

<mosaic_0001>
module attributes {stable_mosaic.version = 11 : i64} {
  func.func @deepattnmisl_kernel(%arg0: i32, %arg1: memref<32x128xbf16, #tpu.memory_space<vmem>>, %arg2: memref<128x512xbf16, #tpu.memory_space<vmem>>, %arg3: memref<1x512xf32, #tpu.memory_space<vmem>>, %arg4: memref<4x128x128xbf16, #tpu.memory_space<vmem>>, %arg5: memref<4x1x128xf32, #tpu.memory_space<vmem>>, %arg6: memref<128x128xbf16, #tpu.memory_space<vmem>>, %arg7: memref<1x128xf32, #tpu.memory_space<vmem>>, %arg8: memref<128x256xbf16, #tpu.memory_space<vmem>>, %arg9: memref<1x256xf32, #tpu.memory_space<vmem>>, %arg10: memref<1x128xf32, #tpu.memory_space<vmem>>, %arg11: memref<1x1xf32, #tpu.memory_space<vmem>>, %arg12: memref<128x128xbf16, #tpu.memory_space<vmem>>, %arg13: memref<1x128xf32, #tpu.memory_space<vmem>>, %arg14: memref<32x128xf32, #tpu.memory_space<vmem>>) attributes {dimension_semantics = [#tpu.dimension_semantics<parallel>], iteration_bounds = array<i64: 1>, scalar_prefetch = 0 : i64, scratch_operands = 0 : i64, tpu.core_type = #tpu.core_type<tc>, window_params = [{transform_indices = @transform_0, window_bounds = array<i64: 32, 128>}, {pipeline_mode = #tpu.pipeline_mode<synchronous>, transform_indices = @transform_1, window_bounds = array<i64: 128, 512>}, {pipeline_mode = #tpu.pipeline_mode<synchronous>, transform_indices = @transform_2, window_bounds = array<i64: 1, 512>}, {pipeline_mode = #tpu.pipeline_mode<synchronous>, transform_indices = @transform_3, window_bounds = array<i64: 4, 128, 128>}, {pipeline_mode = #tpu.pipeline_mode<synchronous>, transform_indices = @transform_4, window_bounds = array<i64: 4, 1, 128>}, {pipeline_mode = #tpu.pipeline_mode<synchronous>, transform_indices = @transform_5, window_bounds = array<i64: 128, 128>}, {pipeline_mode = #tpu.pipeline_mode<synchronous>, transform_indices = @transform_6, window_bounds = array<i64: 1, 128>}, {pipeline_mode = #tpu.pipeline_mode<synchronous>, transform_indices = @transform_7, window_bounds = array<i64: 128, 256>}, {pipeline_mode = #tpu.pipeline_mode<synchronous>, transform_indices = @transform_8, window_bounds = array<i64: 1, 256>}, {pipeline_mode = #tpu.pipeline_mode<synchronous>, transform_indices = @transform_9, window_bounds = array<i64: 1, 128>}, {pipeline_mode = #tpu.pipeline_mode<synchronous>, transform_indices = @transform_10, window_bounds = array<i64: 1, 1>}, {pipeline_mode = #tpu.pipeline_mode<synchronous>, transform_indices = @transform_11, window_bounds = array<i64: 128, 128>}, {pipeline_mode = #tpu.pipeline_mode<synchronous>, transform_indices = @transform_12, window_bounds = array<i64: 1, 128>}, {transform_indices = @transform_13, window_bounds = array<i64: 32, 128>}]} {
    %c0 = arith.constant 0 : index
    %c0_0 = arith.constant 0 : index
    %0 = vector.load %arg1[%c0, %c0_0] : memref<32x128xbf16, #tpu.memory_space<vmem>>, vector<32x128xbf16>
    %c0_1 = arith.constant 0 : index
    %c0_2 = arith.constant 0 : index
    %1 = vector.load %arg2[%c0_1, %c0_2] : memref<128x512xbf16, #tpu.memory_space<vmem>>, vector<128x512xbf16>
    %cst = arith.constant dense<0.000000e+00> : vector<32x512xf32>
    %2 = tpu.matmul %0, %1, %cst {dimension_numbers = #tpu.dot_dimension_numbers<[1], [0], [0], [1], [0, 0, 1, 1], [], []>} : vector<32x128xbf16>, vector<128x512xbf16>, vector<32x512xf32> -> vector<32x512xf32>
    %c0_3 = arith.constant 0 : index
    %c0_4 = arith.constant 0 : index
    %3 = vector.load %arg3[%c0_3, %c0_4] : memref<1x512xf32, #tpu.memory_space<vmem>>, vector<1x512xf32>
    %4 = vector.broadcast %3 : vector<1x512xf32> to vector<32x512xf32>
    %5 = arith.addf %2, %4 : vector<32x512xf32>
    %cst_5 = arith.constant 0.000000e+00 : f32
    %6 = vector.broadcast %cst_5 : f32 to vector<32x512xf32>
    %7 = arith.maximumf %5, %6 : vector<32x512xf32>
    %8 = vector.extract_strided_slice %7 {offsets = [0, 0], sizes = [32, 128], strides = [1, 1]} : vector<32x512xf32> to vector<32x128xf32>
    %9 = arith.truncf %8 : vector<32x128xf32> to vector<32x128xbf16>
    %c0_6 = arith.constant 0 : index
    %c0_7 = arith.constant 0 : index
    %c0_8 = arith.constant 0 : index
    %10 = vector.load %arg4[%c0_6, %c0_7, %c0_8] : memref<4x128x128xbf16, #tpu.memory_space<vmem>>, vector<1x128x128xbf16>
    %11 = vector.shape_cast %10 : vector<1x128x128xbf16> to vector<128x128xbf16>
    %cst_9 = arith.constant dense<0.000000e+00> : vector<32x128xf32>
    %12 = tpu.matmul %9, %11, %cst_9 {dimension_numbers = #tpu.dot_dimension_numbers<[1], [0], [0], [1], [0, 0, 1, 1], [], []>} : vector<32x128xbf16>, vector<128x128xbf16>, vector<32x128xf32> -> vector<32x128xf32>
    %c0_10 = arith.constant 0 : index
    %c0_11 = arith.constant 0 : index
    %c0_12 = arith.constant 0 : index
    %13 = vector.load %arg5[%c0_10, %c0_11, %c0_12] : memref<4x1x128xf32, #tpu.memory_space<vmem>>, vector<1x1x128xf32>
    %14 = vector.shape_cast %13 : vector<1x1x128xf32> to vector<1x128xf32>
    %15 = vector.broadcast %14 : vector<1x128xf32> to vector<32x128xf32>
    %16 = arith.addf %12, %15 : vector<32x128xf32>
    %cst_13 = arith.constant 0.000000e+00 : f32
    %17 = vector.broadcast %cst_13 : f32 to vector<32x128xf32>
    %18 = arith.maximumf %16, %17 : vector<32x128xf32>
    %19 = arith.truncf %18 : vector<32x128xf32> to vector<32x128xbf16>
    %c0_14 = arith.constant 0 : index
    %c0_15 = arith.constant 0 : index
    %20 = vector.load %arg6[%c0_14, %c0_15] : memref<128x128xbf16, #tpu.memory_space<vmem>>, vector<128x128xbf16>
    %cst_16 = arith.constant dense<0.000000e+00> : vector<32x128xf32>
    %21 = tpu.matmul %19, %20, %cst_16 {dimension_numbers = #tpu.dot_dimension_numbers<[1], [0], [0], [1], [0, 0, 1, 1], [], []>} : vector<32x128xbf16>, vector<128x128xbf16>, vector<32x128xf32> -> vector<32x128xf32>
    %c0_17 = arith.constant 0 : index
    %c0_18 = arith.constant 0 : index
    %22 = vector.load %arg7[%c0_17, %c0_18] : memref<1x128xf32, #tpu.memory_space<vmem>>, vector<1x128xf32>
    %23 = vector.broadcast %22 : vector<1x128xf32> to vector<32x128xf32>
    %24 = arith.addf %21, %23 : vector<32x128xf32>
    %cst_19 = arith.constant 0.000000e+00 : f32
    %25 = vector.broadcast %cst_19 : f32 to vector<32x128xf32>
    %26 = arith.maximumf %24, %25 : vector<32x128xf32>
    %27 = arith.truncf %26 : vector<32x128xf32> to vector<32x128xbf16>
    %c0_20 = arith.constant 0 : index
    %c0_21 = arith.constant 0 : index
    %28 = vector.load %arg8[%c0_20, %c0_21] : memref<128x256xbf16, #tpu.memory_space<vmem>>, vector<128x256xbf16>
    %cst_22 = arith.constant dense<0.000000e+00> : vector<32x256xf32>
    %29 = tpu.matmul %27, %28, %cst_22 {dimension_numbers = #tpu.dot_dimension_numbers<[1], [0], [0], [1], [0, 0, 1, 1], [], []>} : vector<32x128xbf16>, vector<128x256xbf16>, vector<32x256xf32> -> vector<32x256xf32>
    %c0_23 = arith.constant 0 : index
    %c0_24 = arith.constant 0 : index
    %30 = vector.load %arg9[%c0_23, %c0_24] : memref<1x256xf32, #tpu.memory_space<vmem>>, vector<1x256xf32>
    %31 = vector.broadcast %30 : vector<1x256xf32> to vector<32x256xf32>
    %32 = arith.addf %29, %31 : vector<32x256xf32>
    %33 = vector.extract_strided_slice %32 {offsets = [0, 0], sizes = [32, 128], strides = [1, 1]} : vector<32x256xf32> to vector<32x128xf32>
    %34 = math.tanh %33 : vector<32x128xf32>
    %35 = vector.extract_strided_slice %32 {offsets = [0, 128], sizes = [32, 128], strides = [1, 1]} : vector<32x256xf32> to vector<32x128xf32>
    %36 = arith.negf %35 : vector<32x128xf32>
    %37 = math.exp %36 : vector<32x128xf32>
    %cst_25 = arith.constant 1.000000e+00 : f32
    %38 = vector.broadcast %cst_25 : f32 to vector<32x128xf32>
    %39 = arith.addf %38, %37 : vector<32x128xf32>
    %40 = arith.divf %38, %39 : vector<32x128xf32>
    %41 = arith.mulf %34, %40 : vector<32x128xf32>
    %c0_26 = arith.constant 0 : index
    %c0_27 = arith.constant 0 : index
    %42 = vector.load %arg10[%c0_26, %c0_27] : memref<1x128xf32, #tpu.memory_space<vmem>>, vector<1x128xf32>
    %43 = vector.broadcast %42 : vector<1x128xf32> to vector<32x128xf32>
    %44 = arith.mulf %41, %43 : vector<32x128xf32>
    %cst_28 = arith.constant dense<0.000000e+00> : vector<32xf32>
    %45 = vector.multi_reduction <add>, %44, %cst_28 [1] : vector<32x128xf32> to vector<32xf32>
    %46 = vector.shape_cast %45 : vector<32xf32> to vector<32x1xf32>
    %c0_29 = arith.constant 0 : index
    %c0_30 = arith.constant 0 : index
    %47 = vector.load %arg11[%c0_29, %c0_30] : memref<1x1xf32, #tpu.memory_space<vmem>>, vector<1x1xf32>
    %48 = vector.broadcast %47 : vector<1x1xf32> to vector<32x1xf32>
    %49 = arith.addf %46, %48 : vector<32x1xf32>
    %50 = vector.extract_strided_slice %7 {offsets = [0, 128], sizes = [32, 128], strides = [1, 1]} : vector<32x512xf32> to vector<32x128xf32>
    %51 = arith.truncf %50 : vector<32x128xf32> to vector<32x128xbf16>
    %c1 = arith.constant 1 : index
    %c0_31 = arith.constant 0 : index
    %c0_32 = arith.constant 0 : index
    %52 = vector.load %arg4[%c1, %c0_31, %c0_32] : memref<4x128x128xbf16, #tpu.memory_space<vmem>>, vector<1x128x128xbf16>
    %53 = vector.shape_cast %52 : vector<1x128x128xbf16> to vector<128x128xbf16>
    %cst_33 = arith.constant dense<0.000000e+00> : vector<32x128xf32>
    %54 = tpu.matmul %51, %53, %cst_33 {dimension_numbers = #tpu.dot_dimension_numbers<[1], [0], [0], [1], [0, 0, 1, 1], [], []>} : vector<32x128xbf16>, vector<128x128xbf16>, vector<32x128xf32> -> vector<32x128xf32>
    %c1_34 = arith.constant 1 : index
    %c0_35 = arith.constant 0 : index
    %c0_36 = arith.constant 0 : index
    %55 = vector.load %arg5[%c1_34, %c0_35, %c0_36] : memref<4x1x128xf32, #tpu.memory_space<vmem>>, vector<1x1x128xf32>
    %56 = vector.shape_cast %55 : vector<1x1x128xf32> to vector<1x128xf32>
    %57 = vector.broadcast %56 : vector<1x128xf32> to vector<32x128xf32>
    %58 = arith.addf %54, %57 : vector<32x128xf32>
    %cst_37 = arith.constant 0.000000e+00 : f32
    %59 = vector.broadcast %cst_37 : f32 to vector<32x128xf32>
    %60 = arith.maximumf %58, %59 : vector<32x128xf32>
    %61 = arith.truncf %60 : vector<32x128xf32> to vector<32x128xbf16>
    %c0_38 = arith.constant 0 : index
    %c0_39 = arith.constant 0 : index
    %62 = vector.load %arg6[%c0_38, %c0_39] : memref<128x128xbf16, #tpu.memory_space<vmem>>, vector<128x128xbf16>
    %cst_40 = arith.constant dense<0.000000e+00> : vector<32x128xf32>
    %63 = tpu.matmul %61, %62, %cst_40 {dimension_numbers = #tpu.dot_dimension_numbers<[1], [0], [0], [1], [0, 0, 1, 1], [], []>} : vector<32x128xbf16>, vector<128x128xbf16>, vector<32x128xf32> -> vector<32x128xf32>
    %c0_41 = arith.constant 0 : index
    %c0_42 = arith.constant 0 : index
    %64 = vector.load %arg7[%c0_41, %c0_42] : memref<1x128xf32, #tpu.memory_space<vmem>>, vector<1x128xf32>
    %65 = vector.broadcast %64 : vector<1x128xf32> to vector<32x128xf32>
    %66 = arith.addf %63, %65 : vector<32x128xf32>
    %cst_43 = arith.constant 0.000000e+00 : f32
    %67 = vector.broadcast %cst_43 : f32 to vector<32x128xf32>
    %68 = arith.maximumf %66, %67 : vector<32x128xf32>
    %69 = arith.truncf %68 : vector<32x128xf32> to vector<32x128xbf16>
    %c0_44 = arith.constant 0 : index
    %c0_45 = arith.constant 0 : index
    %70 = vector.load %arg8[%c0_44, %c0_45] : memref<128x256xbf16, #tpu.memory_space<vmem>>, vector<128x256xbf16>
    %cst_46 = arith.constant dense<0.000000e+00> : vector<32x256xf32>
    %71 = tpu.matmul %69, %70, %cst_46 {dimension_numbers = #tpu.dot_dimension_numbers<[1], [0], [0], [1], [0, 0, 1, 1], [], []>} : vector<32x128xbf16>, vector<128x256xbf16>, vector<32x256xf32> -> vector<32x256xf32>
    %c0_47 = arith.constant 0 : index
    %c0_48 = arith.constant 0 : index
    %72 = vector.load %arg9[%c0_47, %c0_48] : memref<1x256xf32, #tpu.memory_space<vmem>>, vector<1x256xf32>
    %73 = vector.broadcast %72 : vector<1x256xf32> to vector<32x256xf32>
    %74 = arith.addf %71, %73 : vector<32x256xf32>
    %75 = vector.extract_strided_slice %74 {offsets = [0, 0], sizes = [32, 128], strides = [1, 1]} : vector<32x256xf32> to vector<32x128xf32>
    %76 = math.tanh %75 : vector<32x128xf32>
    %77 = vector.extract_strided_slice %74 {offsets = [0, 128], sizes = [32, 128], strides = [1, 1]} : vector<32x256xf32> to vector<32x128xf32>
    %78 = arith.negf %77 : vector<32x128xf32>
    %79 = math.exp %78 : vector<32x128xf32>
    %cst_49 = arith.constant 1.000000e+00 : f32
    %80 = vector.broadcast %cst_49 : f32 to vector<32x128xf32>
    %81 = arith.addf %80, %79 : vector<32x128xf32>
    %82 = arith.divf %80, %81 : vector<32x128xf32>
    %83 = arith.mulf %76, %82 : vector<32x128xf32>
    %c0_50 = arith.constant 0 : index
    %c0_51 = arith.constant 0 : index
    %84 = vector.load %arg10[%c0_50, %c0_51] : memref<1x128xf32, #tpu.memory_space<vmem>>, vector<1x128xf32>
    %85 = vector.broadcast %84 : vector<1x128xf32> to vector<32x128xf32>
    %86 = arith.mulf %83, %85 : vector<32x128xf32>
    %cst_52 = arith.constant dense<0.000000e+00> : vector<32xf32>
    %87 = vector.multi_reduction <add>, %86, %cst_52 [1] : vector<32x128xf32> to vector<32xf32>
    %88 = vector.shape_cast %87 : vector<32xf32> to vector<32x1xf32>
    %c0_53 = arith.constant 0 : index
    %c0_54 = arith.constant 0 : index
    %89 = vector.load %arg11[%c0_53, %c0_54] : memref<1x1xf32, #tpu.memory_space<vmem>>, vector<1x1xf32>
    %90 = vector.broadcast %89 : vector<1x1xf32> to vector<32x1xf32>
    %91 = arith.addf %88, %90 : vector<32x1xf32>
    %92 = vector.extract_strided_slice %7 {offsets = [0, 256], sizes = [32, 128], strides = [1, 1]} : vector<32x512xf32> to vector<32x128xf32>
    %93 = arith.truncf %92 : vector<32x128xf32> to vector<32x128xbf16>
    %c2 = arith.constant 2 : index
    %c0_55 = arith.constant 0 : index
    %c0_56 = arith.constant 0 : index
    %94 = vector.load %arg4[%c2, %c0_55, %c0_56] : memref<4x128x128xbf16, #tpu.memory_space<vmem>>, vector<1x128x128xbf16>
    %95 = vector.shape_cast %94 : vector<1x128x128xbf16> to vector<128x128xbf16>
    %cst_57 = arith.constant dense<0.000000e+00> : vector<32x128xf32>
    %96 = tpu.matmul %93, %95, %cst_57 {dimension_numbers = #tpu.dot_dimension_numbers<[1], [0], [0], [1], [0, 0, 1, 1], [], []>} : vector<32x128xbf16>, vector<128x128xbf16>, vector<32x128xf32> -> vector<32x128xf32>
    %c2_58 = arith.constant 2 : index
    %c0_59 = arith.constant 0 : index
    %c0_60 = arith.constant 0 : index
    %97 = vector.load %arg5[%c2_58, %c0_59, %c0_60] : memref<4x1x128xf32, #tpu.memory_space<vmem>>, vector<1x1x128xf32>
    %98 = vector.shape_cast %97 : vector<1x1x128xf32> to vector<1x128xf32>
    %99 = vector.broadcast %98 : vector<1x128xf32> to vector<32x128xf32>
    %100 = arith.addf %96, %99 : vector<32x128xf32>
    %cst_61 = arith.constant 0.000000e+00 : f32
    %101 = vector.broadcast %cst_61 : f32 to vector<32x128xf32>
    %102 = arith.maximumf %100, %101 : vector<32x128xf32>
    %103 = arith.truncf %102 : vector<32x128xf32> to vector<32x128xbf16>
    %c0_62 = arith.constant 0 : index
    %c0_63 = arith.constant 0 : index
    %104 = vector.load %arg6[%c0_62, %c0_63] : memref<128x128xbf16, #tpu.memory_space<vmem>>, vector<128x128xbf16>
    %cst_64 = arith.constant dense<0.000000e+00> : vector<32x128xf32>
    %105 = tpu.matmul %103, %104, %cst_64 {dimension_numbers = #tpu.dot_dimension_numbers<[1], [0], [0], [1], [0, 0, 1, 1], [], []>} : vector<32x128xbf16>, vector<128x128xbf16>, vector<32x128xf32> -> vector<32x128xf32>
    %c0_65 = arith.constant 0 : index
    %c0_66 = arith.constant 0 : index
    %106 = vector.load %arg7[%c0_65, %c0_66] : memref<1x128xf32, #tpu.memory_space<vmem>>, vector<1x128xf32>
    %107 = vector.broadcast %106 : vector<1x128xf32> to vector<32x128xf32>
    %108 = arith.addf %105, %107 : vector<32x128xf32>
    %cst_67 = arith.constant 0.000000e+00 : f32
    %109 = vector.broadcast %cst_67 : f32 to vector<32x128xf32>
    %110 = arith.maximumf %108, %109 : vector<32x128xf32>
    %111 = arith.truncf %110 : vector<32x128xf32> to vector<32x128xbf16>
    %c0_68 = arith.constant 0 : index
    %c0_69 = arith.constant 0 : index
    %112 = vector.load %arg8[%c0_68, %c0_69] : memref<128x256xbf16, #tpu.memory_space<vmem>>, vector<128x256xbf16>
    %cst_70 = arith.constant dense<0.000000e+00> : vector<32x256xf32>
    %113 = tpu.matmul %111, %112, %cst_70 {dimension_numbers = #tpu.dot_dimension_numbers<[1], [0], [0], [1], [0, 0, 1, 1], [], []>} : vector<32x128xbf16>, vector<128x256xbf16>, vector<32x256xf32> -> vector<32x256xf32>
    %c0_71 = arith.constant 0 : index
    %c0_72 = arith.constant 0 : index
    %114 = vector.load %arg9[%c0_71, %c0_72] : memref<1x256xf32, #tpu.memory_space<vmem>>, vector<1x256xf32>
    %115 = vector.broadcast %114 : vector<1x256xf32> to vector<32x256xf32>
    %116 = arith.addf %113, %115 : vector<32x256xf32>
    %117 = vector.extract_strided_slice %116 {offsets = [0, 0], sizes = [32, 128], strides = [1, 1]} : vector<32x256xf32> to vector<32x128xf32>
    %118 = math.tanh %117 : vector<32x128xf32>
    %119 = vector.extract_strided_slice %116 {offsets = [0, 128], sizes = [32, 128], strides = [1, 1]} : vector<32x256xf32> to vector<32x128xf32>
    %120 = arith.negf %119 : vector<32x128xf32>
    %121 = math.exp %120 : vector<32x128xf32>
    %cst_73 = arith.constant 1.000000e+00 : f32
    %122 = vector.broadcast %cst_73 : f32 to vector<32x128xf32>
    %123 = arith.addf %122, %121 : vector<32x128xf32>
    %124 = arith.divf %122, %123 : vector<32x128xf32>
    %125 = arith.mulf %118, %124 : vector<32x128xf32>
    %c0_74 = arith.constant 0 : index
    %c0_75 = arith.constant 0 : index
    %126 = vector.load %arg10[%c0_74, %c0_75] : memref<1x128xf32, #tpu.memory_space<vmem>>, vector<1x128xf32>
    %127 = vector.broadcast %126 : vector<1x128xf32> to vector<32x128xf32>
    %128 = arith.mulf %125, %127 : vector<32x128xf32>
    %cst_76 = arith.constant dense<0.000000e+00> : vector<32xf32>
    %129 = vector.multi_reduction <add>, %128, %cst_76 [1] : vector<32x128xf32> to vector<32xf32>
    %130 = vector.shape_cast %129 : vector<32xf32> to vector<32x1xf32>
    %c0_77 = arith.constant 0 : index
    %c0_78 = arith.constant 0 : index
    %131 = vector.load %arg11[%c0_77, %c0_78] : memref<1x1xf32, #tpu.memory_space<vmem>>, vector<1x1xf32>
    %132 = vector.broadcast %131 : vector<1x1xf32> to vector<32x1xf32>
    %133 = arith.addf %130, %132 : vector<32x1xf32>
    %134 = vector.extract_strided_slice %7 {offsets = [0, 384], sizes = [32, 128], strides = [1, 1]} : vector<32x512xf32> to vector<32x128xf32>
    %135 = arith.truncf %134 : vector<32x128xf32> to vector<32x128xbf16>
    %c3 = arith.constant 3 : index
    %c0_79 = arith.constant 0 : index
    %c0_80 = arith.constant 0 : index
    %136 = vector.load %arg4[%c3, %c0_79, %c0_80] : memref<4x128x128xbf16, #tpu.memory_space<vmem>>, vector<1x128x128xbf16>
    %137 = vector.shape_cast %136 : vector<1x128x128xbf16> to vector<128x128xbf16>
    %cst_81 = arith.constant dense<0.000000e+00> : vector<32x128xf32>
    %138 = tpu.matmul %135, %137, %cst_81 {dimension_numbers = #tpu.dot_dimension_numbers<[1], [0], [0], [1], [0, 0, 1, 1], [], []>} : vector<32x128xbf16>, vector<128x128xbf16>, vector<32x128xf32> -> vector<32x128xf32>
    %c3_82 = arith.constant 3 : index
    %c0_83 = arith.constant 0 : index
    %c0_84 = arith.constant 0 : index
    %139 = vector.load %arg5[%c3_82, %c0_83, %c0_84] : memref<4x1x128xf32, #tpu.memory_space<vmem>>, vector<1x1x128xf32>
    %140 = vector.shape_cast %139 : vector<1x1x128xf32> to vector<1x128xf32>
    %141 = vector.broadcast %140 : vector<1x128xf32> to vector<32x128xf32>
    %142 = arith.addf %138, %141 : vector<32x128xf32>
    %cst_85 = arith.constant 0.000000e+00 : f32
    %143 = vector.broadcast %cst_85 : f32 to vector<32x128xf32>
    %144 = arith.maximumf %142, %143 : vector<32x128xf32>
    %145 = arith.truncf %144 : vector<32x128xf32> to vector<32x128xbf16>
    %c0_86 = arith.constant 0 : index
    %c0_87 = arith.constant 0 : index
    %146 = vector.load %arg6[%c0_86, %c0_87] : memref<128x128xbf16, #tpu.memory_space<vmem>>, vector<128x128xbf16>
    %cst_88 = arith.constant dense<0.000000e+00> : vector<32x128xf32>
    %147 = tpu.matmul %145, %146, %cst_88 {dimension_numbers = #tpu.dot_dimension_numbers<[1], [0], [0], [1], [0, 0, 1, 1], [], []>} : vector<32x128xbf16>, vector<128x128xbf16>, vector<32x128xf32> -> vector<32x128xf32>
    %c0_89 = arith.constant 0 : index
    %c0_90 = arith.constant 0 : index
    %148 = vector.load %arg7[%c0_89, %c0_90] : memref<1x128xf32, #tpu.memory_space<vmem>>, vector<1x128xf32>
    %149 = vector.broadcast %148 : vector<1x128xf32> to vector<32x128xf32>
    %150 = arith.addf %147, %149 : vector<32x128xf32>
    %cst_91 = arith.constant 0.000000e+00 : f32
    %151 = vector.broadcast %cst_91 : f32 to vector<32x128xf32>
    %152 = arith.maximumf %150, %151 : vector<32x128xf32>
    %153 = arith.truncf %152 : vector<32x128xf32> to vector<32x128xbf16>
    %c0_92 = arith.constant 0 : index
    %c0_93 = arith.constant 0 : index
    %154 = vector.load %arg8[%c0_92, %c0_93] : memref<128x256xbf16, #tpu.memory_space<vmem>>, vector<128x256xbf16>
    %cst_94 = arith.constant dense<0.000000e+00> : vector<32x256xf32>
    %155 = tpu.matmul %153, %154, %cst_94 {dimension_numbers = #tpu.dot_dimension_numbers<[1], [0], [0], [1], [0, 0, 1, 1], [], []>} : vector<32x128xbf16>, vector<128x256xbf16>, vector<32x256xf32> -> vector<32x256xf32>
    %c0_95 = arith.constant 0 : index
    %c0_96 = arith.constant 0 : index
    %156 = vector.load %arg9[%c0_95, %c0_96] : memref<1x256xf32, #tpu.memory_space<vmem>>, vector<1x256xf32>
    %157 = vector.broadcast %156 : vector<1x256xf32> to vector<32x256xf32>
    %158 = arith.addf %155, %157 : vector<32x256xf32>
    %159 = vector.extract_strided_slice %158 {offsets = [0, 0], sizes = [32, 128], strides = [1, 1]} : vector<32x256xf32> to vector<32x128xf32>
    %160 = math.tanh %159 : vector<32x128xf32>
    %161 = vector.extract_strided_slice %158 {offsets = [0, 128], sizes = [32, 128], strides = [1, 1]} : vector<32x256xf32> to vector<32x128xf32>
    %162 = arith.negf %161 : vector<32x128xf32>
    %163 = math.exp %162 : vector<32x128xf32>
    %cst_97 = arith.constant 1.000000e+00 : f32
    %164 = vector.broadcast %cst_97 : f32 to vector<32x128xf32>
    %165 = arith.addf %164, %163 : vector<32x128xf32>
    %166 = arith.divf %164, %165 : vector<32x128xf32>
    %167 = arith.mulf %160, %166 : vector<32x128xf32>
    %c0_98 = arith.constant 0 : index
    %c0_99 = arith.constant 0 : index
    %168 = vector.load %arg10[%c0_98, %c0_99] : memref<1x128xf32, #tpu.memory_space<vmem>>, vector<1x128xf32>
    %169 = vector.broadcast %168 : vector<1x128xf32> to vector<32x128xf32>
    %170 = arith.mulf %167, %169 : vector<32x128xf32>
    %cst_100 = arith.constant dense<0.000000e+00> : vector<32xf32>
    %171 = vector.multi_reduction <add>, %170, %cst_100 [1] : vector<32x128xf32> to vector<32xf32>
    %172 = vector.shape_cast %171 : vector<32xf32> to vector<32x1xf32>
    %c0_101 = arith.constant 0 : index
    %c0_102 = arith.constant 0 : index
    %173 = vector.load %arg11[%c0_101, %c0_102] : memref<1x1xf32, #tpu.memory_space<vmem>>, vector<1x1xf32>
    %174 = vector.broadcast %173 : vector<1x1xf32> to vector<32x1xf32>
    %175 = arith.addf %172, %174 : vector<32x1xf32>
    %176 = arith.maximumf %49, %91 : vector<32x1xf32>
    %177 = arith.maximumf %176, %133 : vector<32x1xf32>
    %178 = arith.maximumf %177, %175 : vector<32x1xf32>
    %179 = arith.subf %49, %178 : vector<32x1xf32>
    %180 = math.exp %179 : vector<32x1xf32>
    %181 = arith.subf %91, %178 : vector<32x1xf32>
    %182 = math.exp %181 : vector<32x1xf32>
    %183 = arith.subf %133, %178 : vector<32x1xf32>
    %184 = math.exp %183 : vector<32x1xf32>
    %185 = arith.subf %175, %178 : vector<32x1xf32>
    %186 = math.exp %185 : vector<32x1xf32>
    %187 = arith.addf %180, %182 : vector<32x1xf32>
    %188 = arith.addf %187, %184 : vector<32x1xf32>
    %189 = arith.addf %188, %186 : vector<32x1xf32>
    %190 = tpu.reciprocal %189 {approx = true} : vector<32x1xf32> -> vector<32x1xf32>
    %191 = arith.mulf %180, %190 : vector<32x1xf32>
    %192 = vector.broadcast %191 : vector<32x1xf32> to vector<32x128xf32>
    %193 = arith.mulf %192, %26 : vector<32x128xf32>
    %194 = arith.mulf %182, %190 : vector<32x1xf32>
    %195 = vector.broadcast %194 : vector<32x1xf32> to vector<32x128xf32>
    %196 = arith.mulf %195, %68 : vector<32x128xf32>
    %197 = arith.addf %193, %196 : vector<32x128xf32>
    %198 = arith.mulf %184, %190 : vector<32x1xf32>
    %199 = vector.broadcast %198 : vector<32x1xf32> to vector<32x128xf32>
    %200 = arith.mulf %199, %110 : vector<32x128xf32>
    %201 = arith.addf %197, %200 : vector<32x128xf32>
    %202 = arith.mulf %186, %190 : vector<32x1xf32>
    %203 = vector.broadcast %202 : vector<32x1xf32> to vector<32x128xf32>
    %204 = arith.mulf %203, %152 : vector<32x128xf32>
    %205 = arith.addf %201, %204 : vector<32x128xf32>
    %206 = arith.truncf %205 : vector<32x128xf32> to vector<32x128xbf16>
    %c0_103 = arith.constant 0 : index
    %c0_104 = arith.constant 0 : index
    %207 = vector.load %arg12[%c0_103, %c0_104] : memref<128x128xbf16, #tpu.memory_space<vmem>>, vector<128x128xbf16>
    %cst_105 = arith.constant dense<0.000000e+00> : vector<32x128xf32>
    %208 = tpu.matmul %206, %207, %cst_105 {dimension_numbers = #tpu.dot_dimension_numbers<[1], [0], [0], [1], [0, 0, 1, 1], [], []>} : vector<32x128xbf16>, vector<128x128xbf16>, vector<32x128xf32> -> vector<32x128xf32>
    %c0_106 = arith.constant 0 : index
    %c0_107 = arith.constant 0 : index
    %209 = vector.load %arg13[%c0_106, %c0_107] : memref<1x128xf32, #tpu.memory_space<vmem>>, vector<1x128xf32>
    %210 = vector.broadcast %209 : vector<1x128xf32> to vector<32x128xf32>
    %211 = arith.addf %208, %210 : vector<32x128xf32>
    %cst_108 = arith.constant 0.000000e+00 : f32
    %212 = vector.broadcast %cst_108 : f32 to vector<32x128xf32>
    %213 = arith.maximumf %211, %212 : vector<32x128xf32>
    %c0_109 = arith.constant 0 : index
    %c0_110 = arith.constant 0 : index
    %214 = vector.load %arg14[%c0_109, %c0_110] : memref<32x128xf32, #tpu.memory_space<vmem>>, vector<32x128xf32>
    tpu.vector_store %arg14[%c0_109, %c0_110], %213 {strides = array<i32>} : memref<32x128xf32, #tpu.memory_space<vmem>>, vector<32x128xf32>,
    return
  }
  func.func @transform_0(%arg0: i32) -> (i32, i32) {
    %c0_i32 = arith.constant 0 : i32
    %c0_i32_0 = arith.constant 0 : i32
    return %arg0, %c0_i32 : i32, i32
  }
  func.func @transform_1(%arg0: i32) -> (i32, i32) {
    %c0_i32 = arith.constant 0 : i32
    %c0_i32_0 = arith.constant 0 : i32
    %c0_i32_1 = arith.constant 0 : i32
    return %c0_i32, %c0_i32_0 : i32, i32
  }
  func.func @transform_2(%arg0: i32) -> (i32, i32) {
    %c0_i32 = arith.constant 0 : i32
    %c0_i32_0 = arith.constant 0 : i32
    %c0_i32_1 = arith.constant 0 : i32
    return %c0_i32, %c0_i32_0 : i32, i32
  }
  func.func @transform_3(%arg0: i32) -> (i32, i32, i32) {
    %c0_i32 = arith.constant 0 : i32
    %c0_i32_0 = arith.constant 0 : i32
    %c0_i32_1 = arith.constant 0 : i32
    %c0_i32_2 = arith.constant 0 : i32
    return %c0_i32, %c0_i32_0, %c0_i32_1 : i32, i32, i32
  }
  func.func @transform_4(%arg0: i32) -> (i32, i32, i32) {
    %c0_i32 = arith.constant 0 : i32
    %c0_i32_0 = arith.constant 0 : i32
    %c0_i32_1 = arith.constant 0 : i32
    %c0_i32_2 = arith.constant 0 : i32
    return %c0_i32, %c0_i32_0, %c0_i32_1 : i32, i32, i32
  }
  func.func @transform_5(%arg0: i32) -> (i32, i32) {
    %c0_i32 = arith.constant 0 : i32
    %c0_i32_0 = arith.constant 0 : i32
    %c0_i32_1 = arith.constant 0 : i32
    return %c0_i32, %c0_i32_0 : i32, i32
  }
  func.func @transform_6(%arg0: i32) -> (i32, i32) {
    %c0_i32 = arith.constant 0 : i32
    %c0_i32_0 = arith.constant 0 : i32
    %c0_i32_1 = arith.constant 0 : i32
    return %c0_i32, %c0_i32_0 : i32, i32
  }
  func.func @transform_7(%arg0: i32) -> (i32, i32) {
    %c0_i32 = arith.constant 0 : i32
    %c0_i32_0 = arith.constant 0 : i32
    %c0_i32_1 = arith.constant 0 : i32
    return %c0_i32, %c0_i32_0 : i32, i32
  }
  func.func @transform_8(%arg0: i32) -> (i32, i32) {
    %c0_i32 = arith.constant 0 : i32
    %c0_i32_0 = arith.constant 0 : i32
    %c0_i32_1 = arith.constant 0 : i32
    return %c0_i32, %c0_i32_0 : i32, i32
  }
  func.func @transform_9(%arg0: i32) -> (i32, i32) {
    %c0_i32 = arith.constant 0 : i32
    %c0_i32_0 = arith.constant 0 : i32
    %c0_i32_1 = arith.constant 0 : i32
    return %c0_i32, %c0_i32_0 : i32, i32
  }
  func.func @transform_10(%arg0: i32) -> (i32, i32) {
    %c0_i32 = arith.constant 0 : i32
    %c0_i32_0 = arith.constant 0 : i32
    %c0_i32_1 = arith.constant 0 : i32
    return %c0_i32, %c0_i32_0 : i32, i32
  }
  func.func @transform_11(%arg0: i32) -> (i32, i32) {
    %c0_i32 = arith.constant 0 : i32
    %c0_i32_0 = arith.constant 0 : i32
    %c0_i32_1 = arith.constant 0 : i32
    return %c0_i32, %c0_i32_0 : i32, i32
  }
  func.func @transform_12(%arg0: i32) -> (i32, i32) {
    %c0_i32 = arith.constant 0 : i32
    %c0_i32_0 = arith.constant 0 : i32
    %c0_i32_1 = arith.constant 0 : i32
    return %c0_i32, %c0_i32_0 : i32, i32
  }
  func.func @transform_13(%arg0: i32) -> (i32, i32) {
    %c0_i32 = arith.constant 0 : i32
    %c0_i32_0 = arith.constant 0 : i32
    return %arg0, %c0_i32 : i32, i32
  }
}

</mosaic_0001>

<bundles_post_ra>
// kernel: deepattnmisl_forward.1
= control target key start
LH: loop header
LB: loop body
LE: loop exit
PB: predicated region body
PF: predicated region fallthrough
CT: control target
= control target key end

     0   :  { %v2778_v1 = vmov 0   ;;  %v85_v48 = vlaneseq  ;;  %s3639_s1 = inlined_call_operand.vmem [shape: bf16[128,512], index: 1, kind: input, shape index: {}]   ;;  %s3640_s0 = inlined_call_operand.vmem [shape: bf16[32,128], index: 0, kind: input, shape index: {}]   ;;  %s3641_s3 = inlined_call_operand.vmem [shape: bf16[4,128,128], index: 3, kind: input, shape index: {}]   ;;  %s3642_s5 = inlined_call_operand.vmem [shape: bf16[128,128], index: 5, kind: input, shape index: {}]   ;;  %s3643_s2 = inlined_call_operand.vmem [shape: f32[1,512], index: 2, kind: input, shape index: {}]   ;;  %s3644_s7 = inlined_call_operand.vmem [shape: bf16[128,256], index: 7, kind: input, shape index: {}]   ;;  %s3645_s4 = inlined_call_operand.vmem [shape: f32[4,1,128], index: 4, kind: input, shape index: {}]   ;;  %s3646_s6 = inlined_call_operand.vmem [shape: f32[1,128], index: 6, kind: input, shape index: {}]   ;;  %s3647_s10 = inlined_call_operand.<no memory space> [shape: f32[1,1], index: 10, kind: input, shape index: {}]   ;;  %s3648_s8 = inlined_call_operand.vmem [shape: f32[1,256], index: 8, kind: input, shape index: {}]   ;;  %s3649_s9 = inlined_call_operand.vmem [shape: f32[1,128], index: 9, kind: input, shape index: {}]   ;;  %s3650_s11 = inlined_call_operand.vmem [shape: bf16[128,128], index: 11, kind: input, shape index: {}]   ;;  %s3651_s12 = inlined_call_operand.vmem [shape: f32[1,128], index: 12, kind: input, shape index: {}]   ;;  %s3652_s13 = inlined_call_operand.vmem [shape: f32[32,128], index: 13, kind: output, shape index: {}]  }
   0x1   :  { %v2514_v0 = vld [vmem:[%s3639_s1 + $0xe4] ss:$16 sps:$4 sm:$0xff]   ;;  %309 = vmatprep.mubr.bf16.mxu0 %v2778_v1  ;;  %362 = vmatprep.mubr.bf16.mxu1 %v2778_v1  ;;  %v2516_v2 = vld [vmem:[%s3639_s1 + $0xe0] ss:$16 sps:$4 sm:$0xff]   ;;  %v2540_v17 = vld [vmem:[%s3641_s3 + $0x38] sm:$0xff]  }
   0x2   :  { %2513 = vset.pattern.permute.xlu1 %v2778_v1  ;;  %2512 = vset.pattern.permute.xlu0 %v2778_v1  ;;  %v2517_v3 = vld [vmem:[%s3639_s1 + $0xc4] ss:$16 sps:$4 sm:$0xff]   ;;  %v2519_v4 = vld [vmem:[%s3639_s1 + $0xc0] ss:$16 sps:$4 sm:$0xff]   ;;  %v2542_v20 = vld [vmem:[%s3641_s3 + $0x28] sm:$0xff]   ;;  %v3024_v49 = vshrl.u32 %v85_v48, 7 }
   0x3   :  { %277 = vmatprep.subr.bf16.mxu0 %v2514_v0  ;;  %v2520_v5 = vld [vmem:[%s3639_s1 + $0xa4] ss:$16 sps:$4 sm:$0xff]   ;;  %v2522_v6 = vld [vmem:[%s3639_s1 + $0xa0] ss:$16 sps:$4 sm:$0xff]   ;;  %v2920_v21 = vld [vmem:[%s3640_s0 + $0x8] sm:$0xff]  }
   0x4   :  { %278 = vmatpush1.bf16.msra.mxu0 %v2516_v2  ;;  %v2523_v7 = vld [vmem:[%s3639_s1 + $0x84] ss:$16 sps:$4 sm:$0xff]   ;;  %v2525_v8 = vld [vmem:[%s3639_s1 + $0x80] ss:$16 sps:$4 sm:$0xff]   ;;  %v2544_v23 = vld [vmem:[%s3641_s3 + $0x18] sm:$0xff]   ;;  %v87_v50 = vsub.s32 0, %v3024_v49 }
   0x5   :  { %279 = vmatprep.subr.bf16.mxu0 %v2517_v3  ;;  %v2526_v9 = vld [vmem:[%s3639_s1 + $0x64] ss:$16 sps:$4 sm:$0xff]   ;;  %v2528_v10 = vld [vmem:[%s3639_s1 + $0x60] ss:$16 sps:$4 sm:$0xff]   ;;  %v2546_v25 = vld [vmem:[%s3641_s3 + $0x8] sm:$0xff]   ;;  %v91_v52 = vsub.s32 1, %v3024_v49 }
   0x6   :  { %v2529_v11 = vld [vmem:[%s3639_s1 + $0x44] ss:$16 sps:$4 sm:$0xff]   ;;  %v2531_v12 = vld [vmem:[%s3639_s1 + $0x40] ss:$16 sps:$4 sm:$0xff]   ;;  %v2548_v27 = vld [vmem:[%s3639_s1 + $0xec] ss:$16 sps:$4 sm:$0xff]  }
   0x7   :  { %v2532_v13 = vld [vmem:[%s3639_s1 + $0x24] ss:$16 sps:$4 sm:$0xff]   ;;  %v2534_v14 = vld [vmem:[%s3639_s1 + $0x20] ss:$16 sps:$4 sm:$0xff]   ;;  %v2550_v28 = vld [vmem:[%s3639_s1 + $0xe8] ss:$16 sps:$4 sm:$0xff]   ;;  %330 = vmatprep.subr.bf16.mxu1 %v2548_v27 }
   0x8   :  { %280 = vmatpush1.bf16.msra.mxu0 %v2519_v4  ;;  %v2535_v15 = vld [vmem:[%s3639_s1 + $0x4] ss:$16 sps:$4 sm:$0xff]   ;;  %v2537_v16 = vld [vmem:[%s3639_s1] ss:$16 sps:$4 sm:$0xff]   ;;  %v2551_v29 = vld [vmem:[%s3639_s1 + $0xcc] ss:$16 sps:$4 sm:$0xff]   ;;  %331 = vmatpush1.bf16.msra.mxu1 %v2550_v28 }
   0x9   :  { %281 = vmatprep.subr.bf16.mxu0 %v2520_v5  ;;  %v2907_v18 = vld [vmem:[%s3640_s0] sm:$0xff]   ;;  %v2541_v19 = vld [vmem:[%s3641_s3 + $0x30] sm:$0xff]   ;;  %v2553_v30 = vld [vmem:[%s3639_s1 + $0xc8] ss:$16 sps:$4 sm:$0xff]   ;;  %332 = vmatprep.subr.bf16.mxu1 %v2551_v29 }
   0xa   :  { %v2543_v22 = vld [vmem:[%s3641_s3 + $0x20] sm:$0xff]   ;;  %v2545_v24 = vld [vmem:[%s3641_s3 + $0x10] sm:$0xff]   ;;  %v2554_v31 = vld [vmem:[%s3639_s1 + $0xac] ss:$16 sps:$4 sm:$0xff]  }
   0xb   :  { %v2547_v26 = vld [vmem:[%s3641_s3] sm:$0xff]   ;;  %v2556_v32 = vld [vmem:[%s3639_s1 + $0xa8] ss:$16 sps:$4 sm:$0xff]   ;;  %v2557_v33 = vld [vmem:[%s3639_s1 + $0x8c] ss:$16 sps:$4 sm:$0xff]  }
   0xc   :  { %282 = vmatpush1.bf16.msra.mxu0 %v2522_v6  ;;  %333 = vmatpush1.bf16.msra.mxu1 %v2553_v30  ;;  %v2559_v34 = vld [vmem:[%s3639_s1 + $0x88] ss:$16 sps:$4 sm:$0xff]   ;;  %v2560_v35 = vld [vmem:[%s3639_s1 + $0x6c] ss:$16 sps:$4 sm:$0xff]   ;;  %v2995_v44 = vld [vmem:[%s3642_s5 + $0x30] sm:$0xff]  }
   0xd   :  { %283 = vmatprep.subr.bf16.mxu0 %v2523_v7  ;;  %334 = vmatprep.subr.bf16.mxu1 %v2554_v31  ;;  %v2562_v36 = vld [vmem:[%s3639_s1 + $0x68] ss:$16 sps:$4 sm:$0xff]   ;;  %v2563_v37 = vld [vmem:[%s3639_s1 + $0x4c] ss:$16 sps:$4 sm:$0xff]   ;;  %v3011_v46 = vld [vmem:[%s3642_s5 + $0x20] sm:$0xff]  }
   0xe   :  { %v2565_v38 = vld [vmem:[%s3639_s1 + $0x48] ss:$16 sps:$4 sm:$0xff]   ;;  %v2566_v39 = vld [vmem:[%s3639_s1 + $0x2c] ss:$16 sps:$4 sm:$0xff]   ;;  %v83_v51 = vld [vmem:[%s3643_s2] sm:$0xf] }
   0xf   :  { %v2568_v40 = vld [vmem:[%s3639_s1 + $0x28] ss:$16 sps:$4 sm:$0xff]   ;;  %v2569_v41 = vld [vmem:[%s3639_s1 + $0xc] ss:$16 sps:$4 sm:$0xff]   ;;  %v88_v53 = vrot.slane %v83_v51, %v87_v50  ;;  %v3035_v55 = vrot.slane %v83_v51, %v91_v52 }
  0x10   :  { %284 = vmatpush1.bf16.msra.mxu0 %v2525_v8  ;;  %335 = vmatpush1.bf16.msra.mxu1 %v2556_v32  ;;  %v2571_v42 = vld [vmem:[%s3639_s1 + $0x8] ss:$16 sps:$4 sm:$0xff]   ;;  %v3106_v29 = vld [vmem:[%s3644_s7 + $0x54] ss:$8 sps:$4 sm:$0xff]  }
  0x11   :  { %285 = vmatprep.subr.bf16.mxu0 %v2526_v9  ;;  %336 = vmatprep.subr.bf16.mxu1 %v2557_v33  ;;  %v2989_v43 = vld [vmem:[%s3642_s5 + $0x38] sm:$0xff]   ;;  %v3004_v45 = vld [vmem:[%s3642_s5 + $0x28] sm:$0xff]  }
  0x12   :  { %v3019_v47 = vld [vmem:[%s3642_s5 + $0x18] sm:$0xff]   ;;  %v3100_v28 = vld [vmem:[%s3644_s7 + $0x60] ss:$8 sps:$4 sm:$0xff]  }
  0x14   :  { %286 = vmatpush1.bf16.msra.mxu0 %v2528_v10  ;;  %337 = vmatpush1.bf16.msra.mxu1 %v2559_v34  ;;  %v3114_v34 = vld [vmem:[%s3644_s7 + $0x50] ss:$8 sps:$4 sm:$0xff]  }
  0x15   :  { %287 = vmatprep.subr.bf16.mxu0 %v2529_v11  ;;  %338 = vmatprep.subr.bf16.mxu1 %v2560_v35 }
  0x18   :  { %288 = vmatpush1.bf16.msra.mxu0 %v2531_v12  ;;  %339 = vmatpush1.bf16.msra.mxu1 %v2562_v36 }
  0x19   :  { %289 = vmatprep.subr.bf16.mxu0 %v2532_v13  ;;  %340 = vmatprep.subr.bf16.mxu1 %v2563_v37 }
  0x1c   :  { %290 = vmatpush1.bf16.msra.mxu0 %v2534_v14  ;;  %341 = vmatpush1.bf16.msra.mxu1 %v2565_v38  ;;  %v3047_v14 = vld [vmem:[%s3642_s5 + $0x10] sm:$0xff]   ;;  %v3122_v38 = vld [vmem:[%s3644_s7 + $0x44] ss:$8 sps:$4 sm:$0xff]  }
  0x1d   :  { %291 = vmatprep.subr.bf16.mxu0 %v2535_v15  ;;  %342 = vmatprep.subr.bf16.mxu1 %v2566_v39  ;;  %v3054_v15 = vld [vmem:[%s3642_s5 + $0x8] sm:$0xff]  }
  0x20   :  { %292 = vmatpush1.bf16.msra.mxu0 %v2537_v16  ;;  %343 = vmatpush1.bf16.msra.mxu1 %v2568_v40  ;;  %v3061_v16 = vld [vmem:[%s3642_s5] sm:$0xff]  }
  0x21   :  { %2331 = vmatprep.subr.bf16.mxu0 %v2540_v17  ;;  %344 = vmatprep.subr.bf16.mxu1 %v2569_v41 }
  0x23   :  { %310 = vmatmul.mubr.bf16.vlgmr.msra.gmra.mxu0 %v2907_v18 }
  0x24   :  { %319 = vmatprep.mubr.bf16.mxu0 %v2778_v1  ;;  %2332 = vmatpush3.bf16.msra.mxu0 %v2540_v17  ;;  %v3068_v17 = vld [vmem:[%s3641_s3 + $0x78] sm:$0xff]  }
  0x25   :  { %2333 = vmatprep.subr.bf16.mxu0 %v2541_v19  ;;  %345 = vmatpush1.bf16.msra.mxu1 %v2571_v42  ;;  %v3132_v42 = vld [vmem:[%s3644_s7 + $0x40] ss:$8 sps:$4 sm:$0xff]  }
  0x26   :  { %2351 = vmatprep.subr.bf16.mxu1 %v2989_v43 }
  0x28   :  { %2334 = vmatpush3.bf16.msra.mxu0 %v2541_v19  ;;  %363 = vmatmul.mubr.bf16.vlgmr.msra.gmra.mxu1 %v2907_v18  ;;  %v99_v19 = vsub.s32 3, %v3024_v49 }
  0x29   :  { %2335 = vmatprep.subr.bf16.mxu0 %v2542_v20  ;;  %2352 = vmatpush3.bf16.msra.mxu1 %v2989_v43 }
  0x2a   :  { %372 = vmatprep.mubr.bf16.mxu1 %v2778_v1  ;;  %2353 = vmatprep.subr.bf16.mxu1 %v2995_v44 }
  0x2b   :  { %320 = vmatmul.mubr.bf16.gmra.mxu0 %v2920_v21 }
  0x2c   :  { %2336 = vmatpush3.bf16.msra.mxu0 %v2542_v20  ;;  %v3077_v20 = vld [vmem:[%s3644_s7 + $0x74] ss:$8 sps:$4 sm:$0xff]  }
  0x2d   :  { %2337 = vmatprep.subr.bf16.mxu0 %v2543_v22  ;;  %2354 = vmatpush3.bf16.msra.mxu1 %v2995_v44 }
  0x2e   :  { %2355 = vmatprep.subr.bf16.mxu1 %v3004_v45 }
  0x30   :  { %2338 = vmatpush3.bf16.msra.mxu0 %v2543_v22  ;;  %373 = vmatmul.mubr.bf16.gmra.mxu1 %v2920_v21  ;;  %v3079_v21 = vrot.slane %v83_v51, %v99_v19  ;;  %v2582_v19 = vld [vmem:[%s3641_s3 + $0x68] sm:$0xff]  }
  0x31   :  { %2339 = vmatprep.subr.bf16.mxu0 %v2544_v23  ;;  %2356 = vmatpush3.bf16.msra.mxu1 %v3004_v45 }
  0x32   :  { %2357 = vmatprep.subr.bf16.mxu1 %v3011_v46 }
  0x34   :  { %2340 = vmatpush3.bf16.msra.mxu0 %v2544_v23  ;;  %v3084_v23 = vld [vmem:[%s3644_s7 + $0x70] ss:$8 sps:$4 sm:$0xff]  }
  0x35   :  { %2341 = vmatprep.subr.bf16.mxu0 %v2545_v24  ;;  %2358 = vmatpush3.bf16.msra.mxu1 %v3011_v46 }
  0x36   :  { %2359 = vmatprep.subr.bf16.mxu1 %v3019_v47 }
  0x38   :  { %2342 = vmatpush3.bf16.msra.mxu0 %v2545_v24  ;;  %v95_v24 = vsub.s32 2, %v3024_v49 }
  0x39   :  { %2343 = vmatprep.subr.bf16.mxu0 %v2546_v25  ;;  %2360 = vmatpush3.bf16.msra.mxu1 %v3019_v47 }
  0x3a   :  { %2361 = vmatprep.subr.bf16.mxu1 %v3047_v14  ;;  %v3108_v31 = vrot.slane %v83_v51, %v95_v24  ;;  %v2584_v24 = vld [vmem:[%s3641_s3 + $0x58] sm:$0xff]  }
  0x3c   :  { %2344 = vmatpush3.bf16.msra.mxu0 %v2546_v25  ;;  %v3091_v25 = vld [vmem:[%s3644_s7 + $0x64] ss:$8 sps:$4 sm:$0xff]  }
  0x3d   :  { %2345 = vmatprep.subr.bf16.mxu0 %v2547_v26  ;;  %2362 = vmatpush3.bf16.msra.mxu1 %v3047_v14 }
  0x3e   :  { %2363 = vmatprep.subr.bf16.mxu1 %v3054_v15 }
  0x40   :  { %2346 = vmatpush3.bf16.msra.mxu0 %v2547_v26 }
  0x41   :  { %2364 = vmatpush3.bf16.msra.mxu1 %v3054_v15  ;;  %761 = vmatprep.subr.bf16.mxu0 %v3077_v20 }
  0x42   :  { %2365 = vmatprep.subr.bf16.mxu1 %v3061_v16 }
  0x45   :  { %2366 = vmatpush3.bf16.msra.mxu1 %v3061_v16 }
  0x46   :  { %2371 = vmatprep.subr.bf16.mxu1 %v3068_v17 }
  0xe3   :  { %v311_v54 = vpop.f32.mrf.mxu0 }
  0xe4   :  { %v312_v57 = vadd.f32 %v311_v54, %v88_v53 }
  0xe5   :  { %v313_v56 = vpop.f32.mrf.mxu0 }
  0xe6   :  { %v314_v59 = vadd.f32 %v313_v56, %v3035_v55  ;;  %v383_v62 = vmax.f32 %v312_v57, 0.0  ;;  %v3145_v56 = vld [vmem:[%s3644_s7 + $0x30] ss:$8 sps:$4 sm:$0xff]  }
  0xe7   :  { %v315_v58 = vpop.f32.mrf.mxu0 }
  0xe8   :  { %v316_v60 = vadd.f32 %v315_v58, %v88_v53  ;;  %v384_v3 = vmax.f32 %v314_v59, 0.0  ;;  %v3071_v18 = vpop.f32.mrf.mxu1 }
  0xe9   :  { %v317_v61 = vpop.f32.mrf.mxu0 }
  0xea   :  { %v387_v63 = vmax.f32 %v316_v60, 0.0  ;;  %v318_v0 = vadd.f32 %v317_v61, %v3035_v55  ;;  %v366_v22 = vpop.f32.mrf.mxu1  ;;  %v2102_v61 = vld [vmem:[%s3645_s4] ss:$0 sm:$0xff] }
  0xeb   :  { %v321_v2 = vpop.f32.mrf.mxu0  ;;  %v367_v26 = vadd.f32 %v366_v22, %v3079_v21  ;;  %v2583_v22 = vld [vmem:[%s3641_s3 + $0x60] sm:$0xff]  }
  0xec   :  { %v399_v4 = vpack.c.bf16 %v387_v63, %v383_v62  ;;  %v388_v5 = vmax.f32 %v318_v0, 0.0  ;;  %v322_v8 = vadd.f32 %v321_v2, %v88_v53  ;;  %v3094_v27 = vpop.f32.mrf.mxu1 }
  0xed   :  { %v3039_v6 = vpop.f32.mrf.mxu0  ;;  %v386_v32 = vmax.f32 %v367_v26, 0.0 }
  0xee   :  { %v3041_v7 = vpack.c.bf16 %v388_v5, %v384_v3  ;;  %2347 = vmatprep.mubr.bf16.mxu0 %v399_v4  ;;  %v391_v11 = vmax.f32 %v322_v8, 0.0  ;;  %v370_v30 = vpop.f32.mrf.mxu1 }
  0xef   :  { %v325_v9 = vpop.f32.mrf.mxu0  ;;  %v371_v33 = vadd.f32 %v370_v30, %v3079_v21  ;;  %v2587_v30 = vld [vmem:[%s3641_s3 + $0x40] sm:$0xff]  }
  0xf0   :  { %v326_v10 = vadd.f32 %v325_v9, %v88_v53  ;;  %v374_v35 = vpop.f32.mrf.mxu1  ;;  %v3139_v53 = vld [vmem:[%s3644_s7 + $0x34] ss:$8 sps:$4 sm:$0xff]  }
  0xf1   :  { %v390_v36 = vmax.f32 %v371_v33, 0.0  ;;  %v375_v37 = vadd.f32 %v374_v35, %v3108_v31  ;;  %v327_v58 = vpop.f32.mrf.mxu0 }
  0xf2   :  { %v395_v12 = vmax.f32 %v326_v10, 0.0  ;;  %v3124_v39 = vpop.f32.mrf.mxu1  ;;  %v328_v26 = vadd.f32 %v327_v58, %v3035_v55 }
  0xf3   :  { %v3126_v40 = vpack.c.bf16 %v390_v36, %v386_v32  ;;  %v393_v48 = vmax.f32 %v375_v37, 0.0  ;;  %v324_v32 = vadd.f32 %v3039_v6, %v3035_v55  ;;  %v3194_v55 = vld [vmem:[%s3644_s7 + $0x24] ss:$8 sps:$4 sm:$0xff]   ;;  %v3199_v6 = vld [vmem:[%s3644_s7 + $0x20] ss:$8 sps:$4 sm:$0xff]  }
  0xf4   :  { %v400_v13 = vpack.c.bf16 %v395_v12, %v391_v11  ;;  %v378_v41 = vpop.f32.mrf.mxu1  ;;  %v396_v33 = vmax.f32 %v328_v26, 0.0  ;;  %v3208_v37 = vld [vmem:[%s3644_s7 + $0x14] ss:$8 sps:$4 sm:$0xff]  }
  0xf5   :  { %v379_v51 = vadd.f32 %v378_v41, %v3108_v31  ;;  %v392_v35 = vmax.f32 %v324_v32, 0.0  ;;  %v3213_v41 = vld [vmem:[%s3644_s7 + $0x10] ss:$8 sps:$4 sm:$0xff]  }
  0xf6   :  { %2348 = vmatmul.mubr.bf16.vlgmr.msra.gmra.mxu0 %v400_v13  ;;  %v2581_v13 = vld [vmem:[%s3641_s3 + $0x70] sm:$0xff]  }
  0xf7   :  { %793 = vmatprep.mubr.bf16.mxu0 %v2778_v1  ;;  %762 = vmatpush1.bf16.msra.mxu0 %v3084_v23  ;;  %v397_v54 = vmax.f32 %v379_v51, 0.0  ;;  %v877_v36 = vpack.c.bf16 %v396_v33, %v392_v35  ;;  %v3227_v51 = vld [vmem:[%s3644_s7] ss:$8 sps:$4 sm:$0xff]   ;;  %v2612_v35 = vld [vmem:[%s3641_s3 + $0xb8] sm:$0xff]  }
  0xf8   :  { %763 = vmatprep.subr.bf16.mxu0 %v3091_v25 }
  0xf9   :  { %v3147_v57 = vpack.c.bf16 %v397_v54, %v393_v48  ;;  %v3222_v48 = vld [vmem:[%s3644_s7 + $0x4] ss:$8 sps:$4 sm:$0xff]   ;;  %v3235_v54 = vpop.f32.mrf.mxu1 }
  0xfb   :  { %764 = vmatpush1.bf16.msra.mxu0 %v3100_v28 }
  0xfc   :  { %765 = vmatprep.subr.bf16.mxu0 %v3106_v29 }
  0xff   :  { %766 = vmatpush1.bf16.msra.mxu0 %v3114_v34 }
 0x100   :  { %767 = vmatprep.subr.bf16.mxu0 %v3122_v38 }
 0x103   :  { %768 = vmatpush1.bf16.msra.mxu0 %v3132_v42 }
 0x104   :  { %769 = vmatprep.subr.bf16.mxu0 %v3139_v53 }
 0x107   :  { %770 = vmatpush1.bf16.msra.mxu0 %v3145_v56 }
 0x108   :  { %771 = vmatprep.subr.bf16.mxu0 %v3194_v55 }
 0x10b   :  { %772 = vmatpush1.bf16.msra.mxu0 %v3199_v6 }
 0x10c   :  { %773 = vmatprep.subr.bf16.mxu0 %v3208_v37 }
 0x10f   :  { %774 = vmatpush1.bf16.msra.mxu0 %v3213_v41 }
 0x110   :  { %775 = vmatprep.subr.bf16.mxu0 %v3222_v48 }
 0x113   :  { %776 = vmatpush1.bf16.msra.mxu0 %v3227_v51 }
 0x114   :  { %2391 = vmatprep.subr.bf16.mxu0 %v2989_v43 }
 0x1b6   :  { %v2349_v59 = vpop.f32.mrf.mxu0 }
 0x1b7   :  { %v515_v2 = vadd.f32 %v2349_v59, %v2102_v61 }
 0x1b8   :  { %v506_v60 = vpop.f32.mrf.mxu0 }
 0x1b9   :  { %v507_v63 = vadd.f32 %v2102_v61, %v506_v60  ;;  %v523_v10 = vmax.f32 %v515_v2, 0.0  ;;  %v3240_v60 = vld [vmem:[%s3646_s6] ss:$0 sm:$0xff] }
 0x1ba   :  { %v2350_v62 = vpop.f32.mrf.mxu0 }
 0x1bb   :  { %v518_v0 = vadd.f32 %v2350_v62, %v2102_v61  ;;  %v521_v8 = vmax.f32 %v507_v63, 0.0 }
 0x1bc   :  { %v509_v3 = vpop.f32.mrf.mxu0 }
 0x1bd   :  { %v510_v4 = vadd.f32 %v2102_v61, %v509_v3  ;;  %v524_v5 = vmax.f32 %v518_v0, 0.0 }
 0x1bf   :  { %v522_v9 = vmax.f32 %v510_v4, 0.0  ;;  %v526_v12 = vpack.c.bf16 %v524_v5, %v523_v10 }
 0x1c1   :  { %v525_v11 = vpack.c.bf16 %v522_v9, %v521_v8 }
 0x1c3   :  { %2367 = vmatprep.mubr.bf16.mxu1 %v525_v11 }
 0x1c4   :  { %2368 = vmatmul.mubr.bf16.vlgmr.msra.gmra.mxu1 %v526_v12 }
 0x1c5   :  { %2372 = vmatpush3.bf16.msra.mxu1 %v3068_v17  ;;  %2387 = vmatprep.mubr.bf16.mxu1 %v3041_v7  ;;  %v2585_v7 = vld [vmem:[%s3641_s3 + $0x50] sm:$0xff]   ;;  %v2586_v17 = vld [vmem:[%s3641_s3 + $0x48] sm:$0xff]  }
 0x1c6   :  { %2373 = vmatprep.subr.bf16.mxu1 %v2581_v13 }
 0x1c9   :  { %2374 = vmatpush3.bf16.msra.mxu1 %v2581_v13 }
 0x1ca   :  { %2375 = vmatprep.subr.bf16.mxu1 %v2582_v19 }
 0x1cd   :  { %2376 = vmatpush3.bf16.msra.mxu1 %v2582_v19  ;;  %v2159_v19 = vld [vmem:[%s3645_s4 + $0x1] ss:$0 sm:$0xff] }
 0x1ce   :  { %2377 = vmatprep.subr.bf16.mxu1 %v2583_v22 }
 0x1d1   :  { %2378 = vmatpush3.bf16.msra.mxu1 %v2583_v22 }
 0x1d2   :  { %2379 = vmatprep.subr.bf16.mxu1 %v2584_v24 }
 0x1d5   :  { %2380 = vmatpush3.bf16.msra.mxu1 %v2584_v24  ;;  %v365_v24 = vadd.f32 %v3071_v18, %v3108_v31 }
 0x1d6   :  { %2381 = vmatprep.subr.bf16.mxu1 %v2585_v7 }
 0x1d9   :  { %2382 = vmatpush3.bf16.msra.mxu1 %v2585_v7  ;;  %v369_v7 = vadd.f32 %v3094_v27, %v3108_v31 }
 0x1da   :  { %2383 = vmatprep.subr.bf16.mxu1 %v2586_v17 }
 0x1dd   :  { %2384 = vmatpush3.bf16.msra.mxu1 %v2586_v17 }
 0x1de   :  { %2385 = vmatprep.subr.bf16.mxu1 %v2587_v30 }
 0x1e1   :  { %2386 = vmatpush3.bf16.msra.mxu1 %v2587_v30 }
 0x1e2   :  { %1061 = vmatprep.subr.bf16.mxu1 %v3077_v20 }
 0x1e4   :  { %2388 = vmatmul.mubr.bf16.vlgmr.msra.gmra.mxu1 %v877_v36 }
 0x1e5   :  { %1062 = vmatpush1.bf16.msra.mxu1 %v3084_v23  ;;  %1093 = vmatprep.mubr.bf16.mxu1 %v2778_v1 }
 0x1e6   :  { %1063 = vmatprep.subr.bf16.mxu1 %v3091_v25 }
 0x1e9   :  { %1064 = vmatpush1.bf16.msra.mxu1 %v3100_v28 }
 0x1ea   :  { %1065 = vmatprep.subr.bf16.mxu1 %v3106_v29 }
 0x1ed   :  { %1066 = vmatpush1.bf16.msra.mxu1 %v3114_v34 }
 0x1ee   :  { %1067 = vmatprep.subr.bf16.mxu1 %v3122_v38 }
 0x1f1   :  { %1068 = vmatpush1.bf16.msra.mxu1 %v3132_v42 }
 0x1f2   :  { %1069 = vmatprep.subr.bf16.mxu1 %v3139_v53 }
 0x1f5   :  { %1070 = vmatpush1.bf16.msra.mxu1 %v3145_v56 }
 0x1f6   :  { %1071 = vmatprep.subr.bf16.mxu1 %v3194_v55 }
 0x1f9   :  { %1072 = vmatpush1.bf16.msra.mxu1 %v3199_v6 }
 0x1fa   :  { %1073 = vmatprep.subr.bf16.mxu1 %v3208_v37 }
 0x1fd   :  { %1074 = vmatpush1.bf16.msra.mxu1 %v3213_v41 }
 0x1fe   :  { %1075 = vmatprep.subr.bf16.mxu1 %v3222_v48 }
 0x201   :  { %1076 = vmatpush1.bf16.msra.mxu1 %v3227_v51 }
 0x202   :  { %2431 = vmatprep.subr.bf16.mxu1 %v2989_v43 }
 0x284   :  { %v2369_v58 = vpop.f32.mrf.mxu1 }
 0x285   :  { %v3258_v8 = vadd.f32 %v2369_v58, %v3240_v60  ;;  %v385_v58 = vmax.f32 %v365_v24, 0.0  ;;  %v2618_v24 = vld [vmem:[%s3641_s3 + $0x88] sm:$0xff]  }
 0x286   :  { %v632_v59 = vpop.f32.mrf.mxu1 }
 0x287   :  { %v3243_v62 = vadd.f32 %v3240_v60, %v632_v59  ;;  %v649_v10 = vmax.f32 %v3258_v8, 0.0  ;;  %v389_v59 = vmax.f32 %v369_v7, 0.0  ;;  %v2619_v7 = vld [vmem:[%s3641_s3 + $0x80] sm:$0xff]  }
 0x288   :  { %v2370_v61 = vpop.f32.mrf.mxu1 }
 0x289   :  { %v647_v2 = vmax.f32 %v3243_v62, 0.0  ;;  %v3251_v4 = vadd.f32 %v2370_v61, %v3240_v60 }
 0x28a   :  { %v635_v63 = vpop.f32.mrf.mxu1 }
 0x28b   :  { %v3246_v0 = vadd.f32 %v3240_v60, %v635_v63  ;;  %v650_v9 = vmax.f32 %v3251_v4, 0.0 }
 0x28d   :  { %v648_v3 = vmax.f32 %v3246_v0, 0.0  ;;  %v652_v11 = vpack.c.bf16 %v650_v9, %v649_v10 }
 0x28f   :  { %v651_v5 = vpack.c.bf16 %v648_v3, %v647_v2 }
 0x291   :  { %794 = vmatmul.mubr.bf16.vlgmr.msra.gmra.mxu0 %v651_v5  ;;  %v2613_v5 = vld [vmem:[%s3641_s3 + $0xb0] sm:$0xff]  }
 0x292   :  { %2392 = vmatpush3.bf16.msra.mxu0 %v2989_v43  ;;  %803 = vmatprep.mubr.bf16.mxu0 %v2778_v1 }
 0x293   :  { %2393 = vmatprep.subr.bf16.mxu0 %v2995_v44 }
 0x296   :  { %2394 = vmatpush3.bf16.msra.mxu0 %v2995_v44 }
 0x297   :  { %2395 = vmatprep.subr.bf16.mxu0 %v3004_v45 }
 0x299   :  { %804 = vmatmul.mubr.bf16.gmra.mxu0 %v652_v11  ;;  %v1162_v11 = vpack.c.bf16 %v389_v59, %v385_v58 }
 0x29a   :  { %2396 = vmatpush3.bf16.msra.mxu0 %v3004_v45 }
 0x29b   :  { %2397 = vmatprep.subr.bf16.mxu0 %v3011_v46 }
 0x29e   :  { %2398 = vmatpush3.bf16.msra.mxu0 %v3011_v46 }
 0x29f   :  { %2399 = vmatprep.subr.bf16.mxu0 %v3019_v47 }
 0x2a2   :  { %2400 = vmatpush3.bf16.msra.mxu0 %v3019_v47 }
 0x2a3   :  { %2401 = vmatprep.subr.bf16.mxu0 %v3047_v14 }
 0x2a4   :  { %v2389_v12 = vpop.f32.mrf.mxu1 }
 0x2a5   :  { %v994_v30 = vadd.f32 %v2389_v12, %v2159_v19  ;;  %v2614_v12 = vld [vmem:[%s3641_s3 + $0xa8] sm:$0xff]  }
 0x2a6   :  { %v985_v13 = vpop.f32.mrf.mxu1  ;;  %2402 = vmatpush3.bf16.msra.mxu0 %v3047_v14 }
 0x2a7   :  { %2403 = vmatprep.subr.bf16.mxu0 %v3054_v15  ;;  %v986_v17 = vadd.f32 %v2159_v19, %v985_v13  ;;  %v1002_v63 = vmax.f32 %v994_v30, 0.0  ;;  %v2615_v13 = vld [vmem:[%s3641_s3 + $0xa0] sm:$0xff]  }
 0x2a8   :  { %v2390_v22 = vpop.f32.mrf.mxu1 }
 0x2a9   :  { %v997_v26 = vadd.f32 %v2390_v22, %v2159_v19  ;;  %v1000_v18 = vmax.f32 %v986_v17, 0.0  ;;  %v2617_v22 = vld [vmem:[%s3641_s3 + $0x90] sm:$0xff]   ;;  %v669_v17 = vld [vmem:[%s3648_s8] sm:$0x3] }
 0x2aa   :  { %v988_v32 = vpop.f32.mrf.mxu1  ;;  %2404 = vmatpush3.bf16.msra.mxu0 %v3054_v15 }
 0x2ab   :  { %v989_v33 = vadd.f32 %v2159_v19, %v988_v32  ;;  %2405 = vmatprep.subr.bf16.mxu0 %v3061_v16  ;;  %v1003_v36 = vmax.f32 %v997_v26, 0.0  ;;  %v2616_v19 = vld [vmem:[%s3641_s3 + $0x98] sm:$0xff]   ;;  %v3340_v26 = vrot.slane %v669_v17, %v91_v52  ;;  %v3347_v52 = vrot.slane %v669_v17, %v87_v50 }
 0x2ad   :  { %v1001_v61 = vmax.f32 %v989_v33, 0.0  ;;  %v1005_v31 = vpack.c.bf16 %v1003_v36, %v1002_v63 }
 0x2ae   :  { %2406 = vmatpush3.bf16.msra.mxu0 %v3061_v16 }
 0x2af   :  { %v1004_v27 = vpack.c.bf16 %v1001_v61, %v1000_v18  ;;  %2411 = vmatprep.subr.bf16.mxu0 %v2612_v35 }
 0x2b1   :  { %2407 = vmatprep.mubr.bf16.mxu0 %v1004_v27 }
 0x2b2   :  { %2408 = vmatmul.mubr.bf16.vlgmr.msra.gmra.mxu0 %v1005_v31 }
 0x2b3   :  { %2412 = vmatpush3.bf16.msra.mxu0 %v2612_v35  ;;  %2427 = vmatprep.mubr.bf16.mxu0 %v1162_v11 }
 0x2b4   :  { %2413 = vmatprep.subr.bf16.mxu0 %v2613_v5 }
 0x2b7   :  { %2414 = vmatpush3.bf16.msra.mxu0 %v2613_v5 }
 0x2b8   :  { %2415 = vmatprep.subr.bf16.mxu0 %v2614_v12 }
 0x2bb   :  { %2416 = vmatpush3.bf16.msra.mxu0 %v2614_v12 }
 0x2bc   :  { %2417 = vmatprep.subr.bf16.mxu0 %v2615_v13 }
 0x2bf   :  { %2418 = vmatpush3.bf16.msra.mxu0 %v2615_v13 }
 0x2c0   :  { %2419 = vmatprep.subr.bf16.mxu0 %v2616_v19 }
 0x2c3   :  { %2420 = vmatpush3.bf16.msra.mxu0 %v2616_v19 }
 0x2c4   :  { %2421 = vmatprep.subr.bf16.mxu0 %v2617_v22 }
 0x2c7   :  { %2422 = vmatpush3.bf16.msra.mxu0 %v2617_v22 }
 0x2c8   :  { %2423 = vmatprep.subr.bf16.mxu0 %v2618_v24 }
 0x2cb   :  { %2424 = vmatpush3.bf16.msra.mxu0 %v2618_v24 }
 0x2cc   :  { %2425 = vmatprep.subr.bf16.mxu0 %v2619_v7 }
 0x2cf   :  { %2426 = vmatpush3.bf16.msra.mxu0 %v2619_v7 }
 0x2d0   :  { %1347 = vmatprep.subr.bf16.mxu0 %v3077_v20 }
 0x2d2   :  { %2428 = vmatmul.mubr.bf16.vlgmr.msra.gmra.mxu0 %v3147_v57  ;;  %v18_v57 = vstv %s3647_s10 }
 0x2d3   :  { %1348 = vmatpush1.bf16.msra.mxu0 %v3084_v23  ;;  %1379 = vmatprep.mubr.bf16.mxu0 %v2778_v1  ;;  %19 = vst [vmem:[#allocation2] sm:$0x1] %v18_v57 }
 0x2d4   :  { %1349 = vmatprep.subr.bf16.mxu0 %v3091_v25 }
 0x2d7   :  { %1350 = vmatpush1.bf16.msra.mxu0 %v3100_v28 }
 0x2d8   :  { %1351 = vmatprep.subr.bf16.mxu0 %v3106_v29 }
 0x2db   :  { %1352 = vmatpush1.bf16.msra.mxu0 %v3114_v34 }
 0x2dc   :  { %1353 = vmatprep.subr.bf16.mxu0 %v3122_v38 }
 0x2df   :  { %1354 = vmatpush1.bf16.msra.mxu0 %v3132_v42 }
 0x2e0   :  { %1355 = vmatprep.subr.bf16.mxu0 %v3139_v53 }
 0x2e3   :  { %1356 = vmatpush1.bf16.msra.mxu0 %v3145_v56 }
 0x2e4   :  { %1357 = vmatprep.subr.bf16.mxu0 %v3194_v55 }
 0x2e7   :  { %1358 = vmatpush1.bf16.msra.mxu0 %v3199_v6 }
 0x2e8   :  { %1359 = vmatprep.subr.bf16.mxu0 %v3208_v37 }
 0x2eb   :  { %1360 = vmatpush1.bf16.msra.mxu0 %v3213_v41 }
 0x2ec   :  { %1361 = vmatprep.subr.bf16.mxu0 %v3222_v48 }
 0x2ef   :  { %1362 = vmatpush1.bf16.msra.mxu0 %v3227_v51 }
 0x2f0   :  { %2471 = vmatprep.subr.bf16.mxu0 %v2989_v43 }
 0x351   :  { %v795_v30 = vpop.f32.mrf.mxu0 }
 0x352   :  { %v796_v19 = vadd.f32 %v795_v30, %v3347_v52 }
 0x353   :  { %v797_v32 = vpop.f32.mrf.mxu0 }
 0x354   :  { %v798_v33 = vadd.f32 %v797_v32, %v3340_v26 }
 0x355   :  { %v799_v35 = vpop.f32.mrf.mxu0 }
 0x356   :  { %v2136_v36 = vmul.f32 -1.442695, %v798_v33  ;;  %v800_v7 = vadd.f32 %v799_v35, %v3347_v52 }
 0x357   :  { %v801_v58 = vpop.f32.mrf.mxu0 }
 0x358   :  { %2636 = vpow2.f32 %v2136_v36  ;;  %v802_v59 = vadd.f32 %v801_v58, %v3340_v26 }
 0x359   :  { %v805_v18 = vpop.f32.mrf.mxu0 }
 0x35a   :  { %v2137_v61 = vmul.f32 -1.442695, %v802_v59  ;;  %v806_v49 = vadd.f32 %v805_v18, %v3347_v52 }
 0x35b   :  { %v807_v63 = vpop.f32.mrf.mxu0 }
 0x35c   :  { %2638 = vpow2.f32 %v2137_v61  ;;  %v808_v27 = vadd.f32 %v807_v63, %v3340_v26  ;;  %v3357_v63 = vld [vmem:[%s3649_s9] ss:$0 sm:$0xff] }
 0x35d   :  { %v809_v31 = vpop.f32.mrf.mxu0 }
 0x35e   :  { %v2138_v5 = vmul.f32 -1.442695, %v808_v27  ;;  %v810_v33 = vadd.f32 %v809_v31, %v3347_v52 }
 0x35f   :  { %v811_v11 = vpop.f32.mrf.mxu0 }
 0x360   :  { %2640 = vpow2.f32 %v2138_v5  ;;  %v812_v12 = vadd.f32 %v811_v11, %v3340_v26 }
 0x362   :  { %v2139_v13 = vmul.f32 -1.442695, %v812_v12 }
 0x364   :  { %2642 = vpow2.f32 %v2139_v13 }
 0x365   :  { %v2637_v22 = vpop.eup %2636  ;;  %2644 = vtanh.f32 %v796_v19 }
 0x366   :  { %v830_v24 = vadd.f32 1.0, %v2637_v22 }
 0x368   :  { %2646 = vrcp.f32 %v830_v24 }
 0x369   :  { %v2639_v57 = vpop.eup %2638  ;;  %2648 = vtanh.f32 %v800_v7 }
 0x36a   :  { %v831_v32 = vadd.f32 1.0, %v2639_v57 }
 0x36c   :  { %2650 = vrcp.f32 %v831_v32 }
 0x36d   :  { %v2641_v50 = vpop.eup %2640  ;;  %2652 = vtanh.f32 %v806_v49 }
 0x36e   :  { %v832_v17 = vadd.f32 1.0, %v2641_v50 }
 0x370   :  { %2654 = vrcp.f32 %v832_v17 }
 0x371   :  { %v2643_v30 = vpop.eup %2642  ;;  %2656 = vtanh.f32 %v810_v33 }
 0x372   :  { %v833_v36 = vadd.f32 1.0, %v2643_v30  ;;  %v2409_v58 = vpop.f32.mrf.mxu0  ;;  %v2645_v59 = vpop.eup %2644 }
 0x373   :  { %v3377_v30 = vadd.f32 %v2409_v58, %v3240_v60 }
 0x374   :  { %2658 = vrcp.f32 %v833_v36  ;;  %v1040_v35 = vpop.f32.mrf.mxu0 }
 0x375   :  { %v2647_v61 = vpop.eup %2646  ;;  %v3360_v5 = vadd.f32 %v3240_v60, %v1040_v35 }
 0x376   :  { %v2410_v18 = vpop.f32.mrf.mxu0  ;;  %v842_v27 = vmul.f32 %v2647_v61, %v2645_v59  ;;  %v2649_v31 = vpop.eup %2648 }
 0x377   :  { %v1055_v24 = vmax.f32 %v3360_v5, 0.0  ;;  %v3370_v50 = vadd.f32 %v2410_v18, %v3240_v60 }
 0x378   :  { %v1043_v11 = vpop.f32.mrf.mxu0  ;;  %v853_v12 = vmul.f32 %v3357_v63, %v842_v27  ;;  %v1057_v27 = vmax.f32 %v3377_v30, 0.0 }
 0x379   :  { %v2651_v13 = vpop.eup %2650  ;;  %v3364_v19 = vadd.f32 %v3240_v60, %v1043_v11  ;;  %v1058_v61 = vmax.f32 %v3370_v50, 0.0  ;;  %v2189_v11 = vld [vmem:[%s3645_s4 + $0x2] ss:$0 sm:$0xff]  ;;  %v2232_v50 = vld [vmem:[%s3651_s12] ss:$0 sm:$0xff] }
 0x37a   :  { %857 = vadd.xlane.f32.xlu0 %v853_v12  ;;  %v843_v22 = vmul.f32 %v2651_v13, %v2649_v31  ;;  %v2653_v57 = vpop.eup %2652 }
 0x37b   :  { %v1056_v7 = vmax.f32 %v3364_v19, 0.0 }
 0x37c   :  { %v854_v32 = vmul.f32 %v3357_v63, %v843_v22 }
 0x37d   :  { %v2655_v49 = vpop.eup %2654  ;;  %v1059_v17 = vpack.c.bf16 %v1056_v7, %v1055_v24 }
 0x37e   :  { %859 = vadd.xlane.f32.xlu0 %v854_v32  ;;  %v844_v33 = vmul.f32 %v2655_v49, %v2653_v57  ;;  %v2657_v36 = vpop.eup %2656  ;;  %v2620_v57 = vld [vmem:[%s3641_s3 + $0xf8] sm:$0xff]  }
 0x37f   :  { %1094 = vmatmul.mubr.bf16.vlgmr.msra.gmra.mxu1 %v1059_v17 }
 0x380   :  { %2432 = vmatpush3.bf16.msra.mxu1 %v2989_v43  ;;  %v855_v59 = vmul.f32 %v3357_v63, %v844_v33  ;;  %1103 = vmatprep.mubr.bf16.mxu1 %v2778_v1  ;;  %v1060_v43 = vpack.c.bf16 %v1058_v61, %v1057_v27 }
 0x381   :  { %v2659_v35 = vpop.eup %2658  ;;  %2433 = vmatprep.subr.bf16.mxu1 %v2995_v44 }
 0x382   :  { %861 = vadd.xlane.f32.xlu0 %v855_v59  ;;  %v845_v18 = vmul.f32 %v2659_v35, %v2657_v36  ;;  %v2621_v35 = vld [vmem:[%s3641_s3 + $0xf0] sm:$0xff]  }
 0x384   :  { %2434 = vmatpush3.bf16.msra.mxu1 %v2995_v44  ;;  %v856_v58 = vmul.f32 %v3357_v63, %v845_v18  ;;  %v2622_v18 = vld [vmem:[%s3641_s3 + $0xe8] sm:$0xff]  }
 0x385   :  { %2435 = vmatprep.subr.bf16.mxu1 %v3004_v45 }
 0x386   :  { %863 = vadd.xlane.f32.xlu1 %v856_v58  ;;  %v2623_v58 = vld [vmem:[%s3641_s3 + $0xe0] sm:$0xff]  }
 0x387   :  { %1104 = vmatmul.mubr.bf16.gmra.mxu1 %v1060_v43  ;;  %v2624_v43 = vld [vmem:[%s3641_s3 + $0xd8] sm:$0xff]  }
 0x388   :  { %2436 = vmatpush3.bf16.msra.mxu1 %v3004_v45 }
 0x389   :  { %2437 = vmatprep.subr.bf16.mxu1 %v3011_v46 }
 0x38c   :  { %2438 = vmatpush3.bf16.msra.mxu1 %v3011_v46 }
 0x38d   :  { %2439 = vmatprep.subr.bf16.mxu1 %v3019_v47 }
 0x390   :  { %2440 = vmatpush3.bf16.msra.mxu1 %v3019_v47 }
 0x391   :  { %2441 = vmatprep.subr.bf16.mxu1 %v3047_v14 }
 0x392   :  { %v2429_v44 = vpop.f32.mrf.mxu0 }
 0x393   :  { %v1280_v46 = vadd.f32 %v2429_v44, %v2189_v11  ;;  %v2626_v44 = vld [vmem:[%s3641_s3 + $0xc8] sm:$0xff]  }
 0x394   :  { %v1271_v31 = vpop.f32.mrf.mxu0  ;;  %2442 = vmatpush3.bf16.msra.mxu1 %v3047_v14 }
 0x395   :  { %2443 = vmatprep.subr.bf16.mxu1 %v3054_v15  ;;  %v1272_v12 = vadd.f32 %v2189_v11, %v1271_v31  ;;  %v1288_v33 = vmax.f32 %v1280_v46, 0.0  ;;  %v377_v31 = vadd.f32 %v3124_v39, %v3079_v21 }
 0x396   :  { %v2430_v45 = vpop.f32.mrf.mxu0 }
 0x397   :  { %v1283_v13 = vadd.f32 %v2430_v45, %v2189_v11  ;;  %v1286_v49 = vmax.f32 %v1272_v12, 0.0  ;;  %v2627_v45 = vld [vmem:[%s3641_s3 + $0xc0] sm:$0xff]   ;;  %v394_v12 = vmax.f32 %v377_v31, 0.0 }
 0x398   :  { %v1274_v22 = vpop.f32.mrf.mxu0  ;;  %2444 = vmatpush3.bf16.msra.mxu1 %v3054_v15 }
 0x399   :  { %v1275_v47 = vadd.f32 %v2189_v11, %v1274_v22  ;;  %2445 = vmatprep.subr.bf16.mxu1 %v3061_v16  ;;  %v1289_v32 = vmax.f32 %v1283_v13, 0.0  ;;  %v381_v11 = vadd.f32 %v3235_v54, %v3079_v21 }
 0x39b   :  { %v1287_v17 = vmax.f32 %v1275_v47, 0.0  ;;  %v1291_v59 = vpack.c.bf16 %v1289_v32, %v1288_v33  ;;  %v398_v13 = vmax.f32 %v381_v11, 0.0 }
 0x39c   :  { %2446 = vmatpush3.bf16.msra.mxu1 %v3061_v16 }
 0x39d   :  { %v1290_v36 = vpack.c.bf16 %v1287_v17, %v1286_v49  ;;  %2451 = vmatprep.subr.bf16.mxu1 %v2620_v57  ;;  %v1449_v46 = vpack.c.bf16 %v398_v13, %v394_v12 }
 0x39f   :  { %2447 = vmatprep.mubr.bf16.mxu1 %v1290_v36 }
 0x3a0   :  { %2448 = vmatmul.mubr.bf16.vlgmr.msra.gmra.mxu1 %v1291_v59 }
 0x3a1   :  { %2452 = vmatpush3.bf16.msra.mxu1 %v2620_v57  ;;  %2467 = vmatprep.mubr.bf16.mxu1 %v3126_v40  ;;  %v2625_v40 = vld [vmem:[%s3641_s3 + $0xd0] sm:$0xff]  }
 0x3a2   :  { %2453 = vmatprep.subr.bf16.mxu1 %v2621_v35 }
 0x3a5   :  { %2454 = vmatpush3.bf16.msra.mxu1 %v2621_v35 }
 0x3a6   :  { %2455 = vmatprep.subr.bf16.mxu1 %v2622_v18 }
 0x3a9   :  { %2456 = vmatpush3.bf16.msra.mxu1 %v2622_v18 }
 0x3aa   :  { %2457 = vmatprep.subr.bf16.mxu1 %v2623_v58 }
 0x3ad   :  { %2458 = vmatpush3.bf16.msra.mxu1 %v2623_v58 }
 0x3ae   :  { %2459 = vmatprep.subr.bf16.mxu1 %v2624_v43 }
 0x3b1   :  { %2460 = vmatpush3.bf16.msra.mxu1 %v2624_v43 }
 0x3b2   :  { %2461 = vmatprep.subr.bf16.mxu1 %v2625_v40 }
 0x3b5   :  { %2462 = vmatpush3.bf16.msra.mxu1 %v2625_v40 }
 0x3b6   :  { %2463 = vmatprep.subr.bf16.mxu1 %v2626_v44 }
 0x3b9   :  { %2464 = vmatpush3.bf16.msra.mxu1 %v2626_v44 }
 0x3ba   :  { %2465 = vmatprep.subr.bf16.mxu1 %v2627_v45 }
 0x3bd   :  { %2466 = vmatpush3.bf16.msra.mxu1 %v2627_v45 }
 0x3be   :  { %1633 = vmatprep.subr.bf16.mxu1 %v3077_v20 }
 0x3c0   :  { %2468 = vmatmul.mubr.bf16.vlgmr.msra.gmra.mxu1 %v1449_v46 }
 0x3c1   :  { %1634 = vmatpush1.bf16.msra.mxu1 %v3084_v23  ;;  %1665 = vmatprep.mubr.bf16.mxu1 %v2778_v1 }
 0x3c2   :  { %1635 = vmatprep.subr.bf16.mxu1 %v3091_v25 }
 0x3c5   :  { %1636 = vmatpush1.bf16.msra.mxu1 %v3100_v28 }
 0x3c6   :  { %1637 = vmatprep.subr.bf16.mxu1 %v3106_v29 }
 0x3c9   :  { %1638 = vmatpush1.bf16.msra.mxu1 %v3114_v34 }
 0x3ca   :  { %1639 = vmatprep.subr.bf16.mxu1 %v3122_v38 }
 0x3cd   :  { %1640 = vmatpush1.bf16.msra.mxu1 %v3132_v42 }
 0x3ce   :  { %1641 = vmatprep.subr.bf16.mxu1 %v3139_v53 }
 0x3d1   :  { %1642 = vmatpush1.bf16.msra.mxu1 %v3145_v56 }
 0x3d2   :  { %1643 = vmatprep.subr.bf16.mxu1 %v3194_v55 }
 0x3d5   :  { %1644 = vmatpush1.bf16.msra.mxu1 %v3199_v6 }
 0x3d6   :  { %1645 = vmatprep.subr.bf16.mxu1 %v3208_v37 }
 0x3d9   :  { %1646 = vmatpush1.bf16.msra.mxu1 %v3213_v41 }
 0x3da   :  { %1647 = vmatprep.subr.bf16.mxu1 %v3222_v48 }
 0x3dd   :  { %1648 = vmatpush1.bf16.msra.mxu1 %v3227_v51 }
 0x43f   :  { %v1095_v20 = vpop.f32.mrf.mxu1 }
 0x440   :  { %v1096_v48 = vadd.f32 %v1095_v20, %v3347_v52 }
 0x441   :  { %v1097_v21 = vpop.f32.mrf.mxu1 }
 0x442   :  { %v1098_v23 = vadd.f32 %v1097_v21, %v3340_v26 }
 0x443   :  { %v1099_v25 = vpop.f32.mrf.mxu1 }
 0x444   :  { %v2168_v28 = vmul.f32 -1.442695, %v1098_v23  ;;  %v1100_v22 = vadd.f32 %v1099_v25, %v3347_v52 }
 0x445   :  { %v1101_v29 = vpop.f32.mrf.mxu1 }
 0x446   :  { %2660 = vpow2.f32 %v2168_v28  ;;  %v1102_v34 = vadd.f32 %v1101_v29, %v3340_v26 }
 0x447   :  { %v1105_v38 = vpop.f32.mrf.mxu1 }
 0x448   :  { %v2169_v39 = vmul.f32 -1.442695, %v1102_v34  ;;  %v1106_v32 = vadd.f32 %v1105_v38, %v3347_v52 }
 0x449   :  { %v1107_v42 = vpop.f32.mrf.mxu1 }
 0x44a   :  { %2662 = vpow2.f32 %v2169_v39  ;;  %v1108_v53 = vadd.f32 %v1107_v42, %v3340_v26 }
 0x44b   :  { %v1109_v56 = vpop.f32.mrf.mxu1 }
 0x44c   :  { %v2170_v55 = vmul.f32 -1.442695, %v1108_v53  ;;  %v1110_v33 = vadd.f32 %v1109_v56, %v3347_v52  ;;  %v2772_v56 = vld [vmem:[%s3642_s5 + $0x38] sm:$0xff]  }
 0x44d   :  { %v1111_v6 = vpop.f32.mrf.mxu1 }
 0x44e   :  { %2664 = vpow2.f32 %v2170_v55  ;;  %v1112_v37 = vadd.f32 %v1111_v6, %v3340_v26 }
 0x450   :  { %v2171_v41 = vmul.f32 -1.442695, %v1112_v37 }
 0x452   :  { %2666 = vpow2.f32 %v2171_v41  ;;  %v2773_v41 = vld [vmem:[%s3642_s5 + $0x30] sm:$0xff]  }
 0x453   :  { %v2661_v51 = vpop.eup %2660  ;;  %2668 = vtanh.f32 %v1096_v48 }
 0x454   :  { %v1130_v54 = vadd.f32 1.0, %v2661_v51 }
 0x456   :  { %2670 = vrcp.f32 %v1130_v54 }
 0x457   :  { %v2663_v47 = vpop.eup %2662  ;;  %2672 = vtanh.f32 %v1100_v22 }
 0x458   :  { %v1131_v57 = vadd.f32 1.0, %v2663_v47  ;;  %v2774_v47 = vld [vmem:[%s3642_s5 + $0x28] sm:$0xff]  }
 0x45a   :  { %2674 = vrcp.f32 %v1131_v57  ;;  %v2775_v57 = vld [vmem:[%s3642_s5 + $0x20] sm:$0xff]  }
 0x45b   :  { %v2665_v49 = vpop.eup %2664  ;;  %2676 = vtanh.f32 %v1106_v32  ;;  %v2776_v32 = vld [vmem:[%s3642_s5 + $0x18] sm:$0xff]  }
 0x45c   :  { %v1132_v17 = vadd.f32 1.0, %v2665_v49 }
 0x45e   :  { %2678 = vrcp.f32 %v1132_v17 }
 0x45f   :  { %v2667_v36 = vpop.eup %2666  ;;  %2680 = vtanh.f32 %v1110_v33  ;;  %v2219_v33 = vld [vmem:[%s3645_s4 + $0x3] ss:$0 sm:$0xff] }
 0x460   :  { %v1133_v59 = vadd.f32 1.0, %v2667_v36  ;;  %v2449_v35 = vpop.f32.mrf.mxu1  ;;  %v2669_v18 = vpop.eup %2668 }
 0x461   :  { %v3478_v42 = vadd.f32 %v2449_v35, %v3240_v60 }
 0x462   :  { %2682 = vrcp.f32 %v1133_v59  ;;  %v1326_v58 = vpop.f32.mrf.mxu1 }
 0x463   :  { %v2671_v43 = vpop.eup %2670  ;;  %v3461_v31 = vadd.f32 %v3240_v60, %v1326_v58  ;;  %v1343_v51 = vmax.f32 %v3478_v42, 0.0 }
 0x464   :  { %v2450_v40 = vpop.f32.mrf.mxu1  ;;  %v1142_v44 = vmul.f32 %v2671_v43, %v2669_v18  ;;  %v2673_v11 = vpop.eup %2672 }
 0x465   :  { %v1341_v21 = vmax.f32 %v3461_v31, 0.0  ;;  %v3471_v34 = vadd.f32 %v2450_v40, %v3240_v60 }
 0x466   :  { %v1329_v45 = vpop.f32.mrf.mxu1  ;;  %v1146_v12 = vmul.f32 %v3357_v63, %v1142_v44 }
 0x467   :  { %v2675_v13 = vpop.eup %2674  ;;  %v3465_v46 = vadd.f32 %v3240_v60, %v1329_v45  ;;  %v3655_v37 = vmax.f32 %v3471_v34, 0.0  ;;  %v2777_v45 = vld [vmem:[%s3642_s5] sm:$0xff]  }
 0x468   :  { %1150 = vadd.xlane.f32.xlu1 %v1146_v12  ;;  %v1143_v20 = vmul.f32 %v2675_v13, %v2673_v11  ;;  %v2677_v25 = vpop.eup %2676 }
 0x469   :  { %v1342_v23 = vmax.f32 %v3465_v46, 0.0  ;;  %v1346_v22 = vpack.c.bf16 %v3655_v37, %v1343_v51 }
 0x46a   :  { %v1147_v28 = vmul.f32 %v3357_v63, %v1143_v20 }
 0x46b   :  { %v2679_v29 = vpop.eup %2678  ;;  %v1345_v38 = vpack.c.bf16 %v1342_v23, %v1341_v21 }
 0x46c   :  { %1152 = vadd.xlane.f32.xlu1 %v1147_v28  ;;  %v1144_v39 = vmul.f32 %v2679_v29, %v2677_v25  ;;  %v2681_v53 = vpop.eup %2680 }
 0x46d   :  { %1380 = vmatmul.mubr.bf16.vlgmr.msra.gmra.mxu0 %v1345_v38 }
 0x46e   :  { %2472 = vmatpush3.bf16.msra.mxu0 %v2772_v56  ;;  %v1148_v55 = vmul.f32 %v3357_v63, %v1144_v39  ;;  %1389 = vmatprep.mubr.bf16.mxu0 %v2778_v1 }
 0x46f   :  { %v2683_v6 = vpop.eup %2682  ;;  %2473 = vmatprep.subr.bf16.mxu0 %v2773_v41 }
 0x470   :  { %1154 = vadd.xlane.f32.xlu0 %v1148_v55  ;;  %v1145_v48 = vmul.f32 %v2683_v6, %v2681_v53 }
 0x472   :  { %2474 = vmatpush3.bf16.msra.mxu0 %v2773_v41  ;;  %v1149_v54 = vmul.f32 %v3357_v63, %v1145_v48 }
 0x473   :  { %2475 = vmatprep.subr.bf16.mxu0 %v2774_v47 }
 0x474   :  { %1156 = vadd.xlane.f32.xlu1 %v1149_v54 }
 0x475   :  { %1390 = vmatmul.mubr.bf16.gmra.mxu0 %v1346_v22 }
 0x476   :  { %2476 = vmatpush3.bf16.msra.mxu0 %v2774_v47 }
 0x477   :  { %2477 = vmatprep.subr.bf16.mxu0 %v2775_v57 }
 0x47a   :  { %2478 = vmatpush3.bf16.msra.mxu0 %v2775_v57 }
 0x47b   :  { %2479 = vmatprep.subr.bf16.mxu0 %v2776_v32 }
 0x47e   :  { %2480 = vmatpush3.bf16.msra.mxu0 %v2776_v32 }
 0x47f   :  { %2481 = vmatprep.subr.bf16.mxu0 %v3047_v14 }
 0x480   :  { %v2469_v49 = vpop.f32.mrf.mxu1 }
 0x481   :  { %v1566_v18 = vadd.f32 %v2469_v49, %v2219_v33 }
 0x482   :  { %v1557_v17 = vpop.f32.mrf.mxu1  ;;  %2482 = vmatpush3.bf16.msra.mxu0 %v3047_v14 }
 0x483   :  { %2483 = vmatprep.subr.bf16.mxu0 %v3054_v15  ;;  %v1558_v59 = vadd.f32 %v2219_v33, %v1557_v17  ;;  %v1574_v14 = vmax.f32 %v1566_v18, 0.0 }
 0x484   :  { %v2470_v36 = vpop.f32.mrf.mxu1 }
 0x485   :  { %v1569_v35 = vadd.f32 %v2470_v36, %v2219_v33  ;;  %v1572_v44 = vmax.f32 %v1558_v59, 0.0 }
 0x486   :  { %v1560_v58 = vpop.f32.mrf.mxu1  ;;  %2484 = vmatpush3.bf16.msra.mxu0 %v3054_v15 }
 0x487   :  { %v1561_v43 = vadd.f32 %v2219_v33, %v1560_v58  ;;  %2485 = vmatprep.subr.bf16.mxu0 %v3061_v16  ;;  %v1575_v40 = vmax.f32 %v1569_v35, 0.0 }
 0x489   :  { %v1573_v11 = vmax.f32 %v1561_v43, 0.0  ;;  %v1577_v13 = vpack.c.bf16 %v1575_v40, %v1574_v14 }
 0x48a   :  { %2486 = vmatpush3.bf16.msra.mxu0 %v2777_v45 }
 0x48b   :  { %v1576_v12 = vpack.c.bf16 %v1573_v11, %v1572_v44 }
 0x48d   :  { %2487 = vmatprep.mubr.bf16.mxu0 %v1576_v12 }
 0x48e   :  { %2488 = vmatmul.mubr.bf16.vlgmr.msra.gmra.mxu0 %v1577_v13 }
 0x52d   :  { %v1381_v20 = vpop.f32.mrf.mxu0 }
 0x52e   :  { %v1382_v47 = vadd.f32 %v1381_v20, %v3347_v52 }
 0x52f   :  { %v1383_v25 = vpop.f32.mrf.mxu0 }
 0x530   :  { %v1384_v15 = vadd.f32 %v1383_v25, %v3340_v26 }
 0x531   :  { %v1385_v28 = vpop.f32.mrf.mxu0 }
 0x532   :  { %v2198_v29 = vmul.f32 -1.442695, %v1384_v15  ;;  %v1386_v49 = vadd.f32 %v1385_v28, %v3347_v52 }
 0x533   :  { %v1387_v16 = vpop.f32.mrf.mxu0 }
 0x534   :  { %2684 = vpow2.f32 %v2198_v29  ;;  %v1388_v38 = vadd.f32 %v1387_v16, %v3340_v26 }
 0x535   :  { %v1391_v39 = vpop.f32.mrf.mxu0 }
 0x536   :  { %v2199_v53 = vmul.f32 -1.442695, %v1388_v38  ;;  %v1392_v36 = vadd.f32 %v1391_v39, %v3347_v52 }
 0x537   :  { %v1393_v56 = vpop.f32.mrf.mxu0 }
 0x538   :  { %2686 = vpow2.f32 %v2199_v53  ;;  %v1394_v55 = vadd.f32 %v1393_v56, %v3340_v26 }
 0x539   :  { %v1395_v6 = vpop.f32.mrf.mxu0 }
 0x53a   :  { %v2200_v41 = vmul.f32 -1.442695, %v1394_v55  ;;  %v1396_v18 = vadd.f32 %v1395_v6, %v3347_v52 }
 0x53b   :  { %v1397_v48 = vpop.f32.mrf.mxu0 }
 0x53c   :  { %2688 = vpow2.f32 %v2200_v41  ;;  %v1398_v54 = vadd.f32 %v1397_v48, %v3340_v26 }
 0x53e   :  { %v2201_v22 = vmul.f32 -1.442695, %v1398_v54 }
 0x540   :  { %2690 = vpow2.f32 %v2201_v22 }
 0x541   :  { %v2685_v57 = vpop.eup %2684  ;;  %2692 = vtanh.f32 %v1382_v47 }
 0x542   :  { %v1416_v32 = vadd.f32 1.0, %v2685_v57 }
 0x544   :  { %2694 = vrcp.f32 %v1416_v32 }
 0x545   :  { %v2687_v17 = vpop.eup %2686  ;;  %2696 = vtanh.f32 %v1386_v49 }
 0x546   :  { %v1417_v33 = vadd.f32 1.0, %v2687_v17 }
 0x548   :  { %2698 = vrcp.f32 %v1417_v33 }
 0x549   :  { %v2689_v59 = vpop.eup %2688  ;;  %2700 = vtanh.f32 %v1392_v36 }
 0x54a   :  { %v1418_v35 = vadd.f32 1.0, %v2689_v59 }
 0x54c   :  { %2702 = vrcp.f32 %v1418_v35 }
 0x54d   :  { %v2691_v58 = vpop.eup %2690  ;;  %2704 = vtanh.f32 %v1396_v18 }
 0x54e   :  { %v1419_v43 = vadd.f32 1.0, %v2691_v58  ;;  %v2489_v40 = vpop.f32.mrf.mxu0  ;;  %v2693_v44 = vpop.eup %2692 }
 0x54f   :  { %v3541_v54 = vadd.f32 %v2489_v40, %v3240_v60 }
 0x550   :  { %2706 = vrcp.f32 %v1419_v43  ;;  %v1612_v11 = vpop.f32.mrf.mxu0 }
 0x551   :  { %v2695_v14 = vpop.eup %2694  ;;  %v3524_v13 = vadd.f32 %v3240_v60, %v1612_v11  ;;  %v3653_v17 = vmax.f32 %v3541_v54, 0.0  ;;  %v3658_v42 = vmax.f32 %v3541_v54, 0.0 }
 0x552   :  { %v2490_v45 = vpop.f32.mrf.mxu0  ;;  %v1428_v12 = vmul.f32 %v2695_v14, %v2693_v44  ;;  %v2697_v20 = vpop.eup %2696 }
 0x553   :  { %v1627_v38 = vmax.f32 %v3524_v13, 0.0  ;;  %v3534_v6 = vadd.f32 %v2490_v45, %v3240_v60 }
 0x554   :  { %v1615_v25 = vpop.f32.mrf.mxu0  ;;  %v1432_v15 = vmul.f32 %v3357_v63, %v1428_v12 }
 0x555   :  { %v2699_v28 = vpop.eup %2698  ;;  %v3528_v29 = vadd.f32 %v3240_v60, %v1615_v25  ;;  %v3654_v32 = vmax.f32 %v3534_v6, 0.0 }
 0x556   :  { %1436 = vadd.xlane.f32.xlu0 %v1432_v15  ;;  %v1429_v16 = vmul.f32 %v2699_v28, %v2697_v20  ;;  %v2701_v53 = vpop.eup %2700 }
 0x557   :  { %v1628_v39 = vmax.f32 %v3528_v29, 0.0  ;;  %v1632_v60 = vpack.c.bf16 %v3654_v32, %v3653_v17 }
 0x558   :  { %v1433_v56 = vmul.f32 %v3357_v63, %v1429_v16 }
 0x559   :  { %v2703_v55 = vpop.eup %2702  ;;  %v1631_v41 = vpack.c.bf16 %v1628_v39, %v1627_v38 }
 0x55a   :  { %1438 = vadd.xlane.f32.xlu1 %v1433_v56  ;;  %v1430_v48 = vmul.f32 %v2703_v55, %v2701_v53  ;;  %v2705_v22 = vpop.eup %2704 }
 0x55b   :  { %1666 = vmatmul.mubr.bf16.vlgmr.msra.gmra.mxu1 %v1631_v41 }
 0x55c   :  { %v1434_v47 = vmul.f32 %v3357_v63, %v1430_v48  ;;  %1675 = vmatprep.mubr.bf16.mxu1 %v2778_v1 }
 0x55d   :  { %v2707_v57 = vpop.eup %2706 }
 0x55e   :  { %1440 = vadd.xlane.f32.xlu0 %v1434_v47  ;;  %v1431_v49 = vmul.f32 %v2707_v57, %v2705_v22 }
 0x560   :  { %v1435_v33 = vmul.f32 %v3357_v63, %v1431_v49 }
 0x562   :  { %1442 = vadd.xlane.f32.xlu1 %v1435_v33 }
 0x563   :  { %1676 = vmatmul.mubr.bf16.gmra.mxu1 %v1632_v60 }
 0x61b   :  { %v1667_v36 = vpop.f32.mrf.mxu1 }
 0x61c   :  { %v1668_v28 = vadd.f32 %v1667_v36, %v3347_v52 }
 0x61d   :  { %v1669_v59 = vpop.f32.mrf.mxu1 }
 0x61e   :  { %v1670_v1 = vadd.f32 %v1669_v59, %v3340_v26 }
 0x61f   :  { %v1671_v35 = vpop.f32.mrf.mxu1 }
 0x620   :  { %v2228_v18 = vmul.f32 -1.442695, %v1670_v1  ;;  %v1672_v56 = vadd.f32 %v1671_v35, %v3347_v52 }
 0x621   :  { %v1673_v58 = vpop.f32.mrf.mxu1 }
 0x622   :  { %2708 = vpow2.f32 %v2228_v18  ;;  %v1674_v43 = vadd.f32 %v1673_v58, %v3340_v26 }
 0x623   :  { %v1677_v40 = vpop.f32.mrf.mxu1 }
 0x624   :  { %v2229_v44 = vmul.f32 -1.442695, %v1674_v43  ;;  %v1678_v48 = vadd.f32 %v1677_v40, %v3347_v52 }
 0x625   :  { %v1679_v11 = vpop.f32.mrf.mxu1 }
 0x626   :  { %2710 = vpow2.f32 %v2229_v44  ;;  %v1680_v14 = vadd.f32 %v1679_v11, %v3340_v26 }
 0x627   :  { %v1681_v45 = vpop.f32.mrf.mxu1 }
 0x628   :  { %v2230_v12 = vmul.f32 -1.442695, %v1680_v14 }
 0x629   :  { %v1683_v20 = vpop.f32.mrf.mxu1 }
 0x62a   :  { %2712 = vpow2.f32 %v2230_v12  ;;  %v1684_v25 = vadd.f32 %v1683_v20, %v3340_v26  ;;  %v1682_v26 = vadd.f32 %v1681_v45, %v3347_v52  ;;  %v858_v20 = vpop.xlane.xlu0 %857 }
 0x62c   :  { %v2231_v15 = vmul.f32 -1.442695, %v1684_v25 }
 0x62e   :  { %2714 = vpow2.f32 %v2231_v15  ;;  %v860_v25 = vpop.xlane.xlu0 %859  ;;  %v864_v15 = vpop.xlane.xlu1 %863 }
 0x62f   :  { %v2709_v16 = vpop.eup %2708  ;;  %2716 = vtanh.f32 %v1668_v28 }
 0x630   :  { %v1702_v53 = vadd.f32 1.0, %v2709_v16 }
 0x632   :  { %2718 = vrcp.f32 %v1702_v53  ;;  %v1151_v28 = vpop.xlane.xlu1 %1150  ;;  %v862_v16 = vpop.xlane.xlu0 %861 }
 0x633   :  { %v2711_v55 = vpop.eup %2710  ;;  %2720 = vtanh.f32 %v1672_v56 }
 0x634   :  { %v1703_v41 = vadd.f32 1.0, %v2711_v55 }
 0x636   :  { %2722 = vrcp.f32 %v1703_v41  ;;  %v1153_v53 = vpop.xlane.xlu1 %1152  ;;  %v1155_v56 = vpop.xlane.xlu0 %1154 }
 0x637   :  { %v2713_v22 = vpop.eup %2712  ;;  %2724 = vtanh.f32 %v1678_v48  ;;  %v2141_v48 = vld [vmem:[#allocation2] ss:$0 sm:$0xff] }
 0x638   :  { %v1704_v47 = vadd.f32 1.0, %v2713_v22  ;;  %v1158_v22 = vadd.f32 %v2141_v48, %v1151_v28 }
 0x63a   :  { %2726 = vrcp.f32 %v1704_v47  ;;  %v1157_v55 = vpop.xlane.xlu1 %1156  ;;  %v1437_v41 = vpop.xlane.xlu0 %1436 }
 0x63b   :  { %v2715_v57 = vpop.eup %2714  ;;  %2728 = vtanh.f32 %v1682_v26 }
 0x63c   :  { %v1705_v49 = vadd.f32 1.0, %v2715_v57  ;;  %v2717_v33 = vpop.eup %2716  ;;  %v872_v57 = vadd.f32 %v2141_v48, %v858_v20 }
 0x63e   :  { %2730 = vrcp.f32 %v1705_v49  ;;  %v1439_v47 = vpop.xlane.xlu1 %1438  ;;  %v1441_v26 = vpop.xlane.xlu0 %1440  ;;  %v1444_v49 = vadd.f32 %v2141_v48, %v1437_v41 }
 0x63f   :  { %v2719_v60 = vpop.eup %2718 }
 0x640   :  { %v1714_v36 = vmul.f32 %v2719_v60, %v2717_v33  ;;  %v2721_v59 = vpop.eup %2720  ;;  %v1734_v33 = vmax.f32 %v872_v57, %v1158_v22  ;;  %v1159_v60 = vadd.f32 %v2141_v48, %v1153_v53  ;;  %v875_v53 = vadd.f32 %v2141_v48, %v864_v15 }
 0x642   :  { %v1718_v1 = vmul.f32 %v3357_v63, %v1714_v36  ;;  %v1443_v36 = vpop.xlane.xlu1 %1442 }
 0x643   :  { %v2723_v35 = vpop.eup %2722 }
 0x644   :  { %1722 = vadd.xlane.f32.xlu0 %v1718_v1  ;;  %v1715_v18 = vmul.f32 %v2723_v35, %v2721_v59  ;;  %v2725_v58 = vpop.eup %2724  ;;  %v1738_v59 = vmax.f32 %v1734_v33, %v1444_v49  ;;  %v873_v35 = vadd.f32 %v2141_v48, %v860_v25  ;;  %v1161_v33 = vadd.f32 %v2141_v48, %v1157_v55 }
 0x646   :  { %v1719_v43 = vmul.f32 %v3357_v63, %v1715_v18  ;;  %v1160_v18 = vadd.f32 %v2141_v48, %v1155_v56 }
 0x647   :  { %v2727_v40 = vpop.eup %2726 }
 0x648   :  { %1724 = vadd.xlane.f32.xlu1 %v1719_v43  ;;  %v1716_v52 = vmul.f32 %v2727_v40, %v2725_v58  ;;  %v2729_v44 = vpop.eup %2728  ;;  %v1445_v58 = vadd.f32 %v2141_v48, %v1439_v47  ;;  %v874_v40 = vadd.f32 %v2141_v48, %v862_v16 }
 0x64a   :  { %v1720_v11 = vmul.f32 %v3357_v63, %v1716_v52  ;;  %v1735_v52 = vmax.f32 %v873_v35, %v1159_v60  ;;  %v1736_v20 = vmax.f32 %v874_v40, %v1160_v18 }
 0x64b   :  { %v2731_v14 = vpop.eup %2730 }
 0x64c   :  { %1726 = vadd.xlane.f32.xlu0 %v1720_v11  ;;  %v1717_v45 = vmul.f32 %v2731_v14, %v2729_v44  ;;  %v1446_v44 = vadd.f32 %v2141_v48, %v1441_v26  ;;  %v1739_v41 = vmax.f32 %v1735_v52, %v1445_v58  ;;  %v1737_v52 = vmax.f32 %v875_v53, %v1161_v33 }
 0x64e   :  { %v1721_v12 = vmul.f32 %v3357_v63, %v1717_v45 }
 0x650   :  { %1728 = vadd.xlane.f32.xlu1 %v1721_v12 }
 0x6cd   :  { %v1723_v63 = vpop.xlane.xlu0 %1722 }
 0x6ce   :  { %v1730_v1 = vadd.f32 %v2141_v48, %v1723_v63  ;;  %v1740_v63 = vmax.f32 %v1736_v20, %v1446_v44 }
 0x6d0   :  { %v1742_v43 = vmax.f32 %v1738_v59, %v1730_v1  ;;  %v1447_v59 = vadd.f32 %v2141_v48, %v1443_v36 }
 0x6d1   :  { %v1725_v11 = vpop.xlane.xlu1 %1724 }
 0x6d2   :  { %v1746_v14 = vsub.f32 %v872_v57, %v1742_v43  ;;  %v1758_v45 = vsub.f32 %v1158_v22, %v1742_v43  ;;  %v1770_v12 = vsub.f32 %v1444_v49, %v1742_v43  ;;  %v1782_v28 = vsub.f32 %v1730_v1, %v1742_v43 }
 0x6d3   :  { %v1731_v17 = vadd.f32 %v2141_v48, %v1725_v11  ;;  %v1741_v20 = vmax.f32 %v1737_v52, %v1447_v59 }
 0x6d4   :  { %v1750_v32 = vmul.f32 1.442695, %v1746_v14  ;;  %v1762_v37 = vmul.f32 1.442695, %v1758_v45  ;;  %v1774_v25 = vmul.f32 1.442695, %v1770_v12 }
 0x6d5   :  { %v1743_v56 = vmax.f32 %v1739_v41, %v1731_v17  ;;  %v1727_v47 = vpop.xlane.xlu0 %1726  ;;  %v1786_v16 = vmul.f32 1.442695, %v1782_v28 }
 0x6d6   :  { %2732 = vpow2.f32 %v1750_v32  ;;  %v1732_v26 = vadd.f32 %v2141_v48, %v1727_v47 }
 0x6d7   :  { %2734 = vpow2.f32 %v1762_v37  ;;  %v1747_v57 = vsub.f32 %v873_v35, %v1743_v56  ;;  %v1759_v22 = vsub.f32 %v1159_v60, %v1743_v56  ;;  %v1771_v49 = vsub.f32 %v1445_v58, %v1743_v56 }
 0x6d8   :  { %v1783_v1 = vsub.f32 %v1731_v17, %v1743_v56  ;;  %v1744_v43 = vmax.f32 %v1740_v63, %v1732_v26  ;;  %2736 = vpow2.f32 %v1774_v25 }
 0x6d9   :  { %v1752_v15 = vmul.f32 1.442695, %v1747_v57  ;;  %v1764_v11 = vmul.f32 1.442695, %v1759_v22  ;;  %v1729_v14 = vpop.xlane.xlu1 %1728  ;;  %2738 = vpow2.f32 %v1786_v16  ;;  %v1776_v55 = vmul.f32 1.442695, %v1771_v49 }
 0x6da   :  { %v1748_v45 = vsub.f32 %v874_v40, %v1744_v43  ;;  %v1760_v12 = vsub.f32 %v1160_v18, %v1744_v43  ;;  %v1788_v32 = vmul.f32 1.442695, %v1783_v1  ;;  %v1733_v36 = vadd.f32 %v2141_v48, %v1729_v14 }
 0x6db   :  { %2740 = vpow2.f32 %v1752_v15  ;;  %v1772_v17 = vsub.f32 %v1446_v44, %v1744_v43  ;;  %v1784_v18 = vsub.f32 %v1732_v26, %v1744_v43 }
 0x6dc   :  { %2742 = vpow2.f32 %v1764_v11  ;;  %v1754_v37 = vmul.f32 1.442695, %v1748_v45  ;;  %v1766_v35 = vmul.f32 1.442695, %v1760_v12  ;;  %v1745_v60 = vmax.f32 %v1741_v20, %v1733_v36 }
 0x6dd   :  { %2744 = vpow2.f32 %v1776_v55  ;;  %v1778_v16 = vmul.f32 1.442695, %v1772_v17  ;;  %v1790_v44 = vmul.f32 1.442695, %v1784_v18 }
 0x6de   :  { %2746 = vpow2.f32 %v1788_v32  ;;  %v1749_v58 = vsub.f32 %v875_v53, %v1745_v60  ;;  %v1761_v28 = vsub.f32 %v1161_v33, %v1745_v60  ;;  %v1773_v41 = vsub.f32 %v1447_v59, %v1745_v60 }
 0x6df   :  { %2748 = vpow2.f32 %v1754_v37  ;;  %v1785_v63 = vsub.f32 %v1733_v36, %v1745_v60 }
 0x6e0   :  { %2750 = vpow2.f32 %v1766_v35  ;;  %v1756_v25 = vmul.f32 1.442695, %v1749_v58  ;;  %v1768_v40 = vmul.f32 1.442695, %v1761_v28  ;;  %v1780_v56 = vmul.f32 1.442695, %v1773_v41 }
 0x6e1   :  { %v1792_v57 = vmul.f32 1.442695, %v1785_v63 }
 0x6e2   :  { %2752 = vpow2.f32 %v1756_v25 }
 0x6e3   :  { %v2733_v47 = vpop.eup %2732  ;;  %2754 = vpow2.f32 %v1768_v40 }
 0x6e4   :  { %v2735_v48 = vpop.eup %2734  ;;  %2756 = vpow2.f32 %v1780_v56 }
 0x6e5   :  { %v1794_v22 = vadd.f32 %v2735_v48, %v2733_v47  ;;  %v2737_v49 = vpop.eup %2736  ;;  %2758 = vpow2.f32 %v1778_v16 }
 0x6e6   :  { %v2739_v53 = vpop.eup %2738  ;;  %2760 = vpow2.f32 %v1792_v57 }
 0x6e7   :  { %v1798_v33 = vadd.f32 %v2737_v49, %v1794_v22  ;;  %2762 = vpow2.f32 %v1790_v44 }
 0x6e8   :  { %v2741_v59 = vpop.eup %2740 }
 0x6e9   :  { %v2743_v1 = vpop.eup %2742  ;;  %v1802_v52 = vadd.f32 %v2739_v53, %v1798_v33 }
 0x6ea   :  { %v1795_v15 = vadd.f32 %v2743_v1, %v2741_v59  ;;  %v2745_v26 = vpop.eup %2744 }
 0x6eb   :  { %2764 = vrcp.f32 %v1802_v52  ;;  %v2747_v43 = vpop.eup %2746 }
 0x6ec   :  { %v1799_v11 = vadd.f32 %v2745_v26, %v1795_v15  ;;  %v2749_v14 = vpop.eup %2748  ;;  %v2628_v15 = vld [vmem:[%s3650_s11 + $0x38] sm:$0xff]  }
 0x6ed   :  { %v2751_v55 = vpop.eup %2750  ;;  %2491 = vmatprep.subr.bf16.mxu0 %v2628_v15 }
 0x6ee   :  { %v1803_v45 = vadd.f32 %v2747_v43, %v1799_v11  ;;  %v1796_v32 = vadd.f32 %v2751_v55, %v2749_v14  ;;  %2492 = vmatpush3.bf16.msra.mxu0 %v2628_v15 }
 0x6ef   :  { %v2753_v12 = vpop.eup %2752 }
 0x6f0   :  { %2766 = vrcp.f32 %v1803_v45  ;;  %v3564_v20 = vpop.eup %2754 }
 0x6f1   :  { %v1797_v36 = vadd.f32 %v3564_v20, %v2753_v12  ;;  %v2757_v37 = vpop.eup %2756 }
 0x6f2   :  { %v2759_v35 = vpop.eup %2758 }
 0x6f3   :  { %v1801_v60 = vadd.f32 %v2757_v37, %v1797_v36  ;;  %v2761_v17 = vpop.eup %2760  ;;  %v1800_v58 = vadd.f32 %v2759_v35, %v1796_v32  ;;  %v2632_v32 = vld [vmem:[%s3650_s11 + $0x18] sm:$0xff]  }
 0x6f4   :  { %v2763_v41 = vpop.eup %2762 }
 0x6f5   :  { %v1805_v28 = vadd.f32 %v2761_v17, %v1801_v60  ;;  %v1804_v25 = vadd.f32 %v2763_v41, %v1800_v58  ;;  %v2635_v60 = vld [vmem:[%s3650_s11] sm:$0xff]  }
 0x6f7   :  { %2768 = vrcp.f32 %v1805_v28 }
 0x6f8   :  { %v2765_v63 = vpop.eup %2764  ;;  %2770 = vrcp.f32 %v1804_v25 }
 0x6f9   :  { %v1838_v40 = vmul.f32 %v2765_v63, %v2735_v48  ;;  %v1810_v18 = vmul.f32 %v2765_v63, %v2733_v47  ;;  %v1870_v16 = vmul.f32 %v2765_v63, %v2737_v49  ;;  %v1902_v22 = vmul.f32 %v2765_v63, %v2739_v53  ;;  %v2629_v53 = vld [vmem:[%s3650_s11 + $0x30] sm:$0xff]  }
 0x6fa   :  { %2493 = vmatprep.subr.bf16.mxu0 %v2629_v53 }
 0x6fb   :  { %1844 = vperm.xlu1 %2513, %v1838_v40   ;;  %1816 = vperm.xlu0 %2512, %v1810_v18  }
 0x6fc   :  { %2494 = vmatpush3.bf16.msra.mxu0 %v2629_v53  ;;  %v3657_v53 = vmax.f32 %v3534_v6, 0.0 }
 0x6fd   :  { %v2767_v56 = vpop.eup %2766 }
 0x6fe   :  { %v1871_v57 = vmul.f32 %v2767_v56, %v2745_v26  ;;  %v1903_v44 = vmul.f32 %v2767_v56, %v2747_v43  ;;  %v1811_v52 = vmul.f32 %v2767_v56, %v2741_v59  ;;  %v1839_v47 = vmul.f32 %v2767_v56, %v2743_v1  ;;  %v2630_v59 = vld [vmem:[%s3650_s11 + $0x28] sm:$0xff]   ;;  %v2631_v1 = vld [vmem:[%s3650_s11 + $0x20] sm:$0xff]  }
 0x6ff   :  { %1876 = vperm.xlu1 %2513, %v1870_v16   ;;  %2495 = vmatprep.subr.bf16.mxu0 %v2630_v59 }
 0x700   :  { %1881 = vperm.xlu0 %2512, %v1871_v57   ;;  %2496 = vmatpush3.bf16.msra.mxu0 %v2630_v59 }
 0x701   :  { %2497 = vmatprep.subr.bf16.mxu0 %v2631_v1 }
 0x703   :  { %1908 = vperm.xlu1 %2513, %v1902_v22  }
 0x704   :  { %1913 = vperm.xlu0 %2512, %v1903_v44   ;;  %v2769_v33 = vpop.eup %2768  ;;  %2498 = vmatpush3.bf16.msra.mxu0 %v2631_v1 }
 0x705   :  { %v1873_v48 = vmul.f32 %v2769_v33, %v2757_v37  ;;  %v2771_v49 = vpop.eup %2770  ;;  %v1905_v26 = vmul.f32 %v2769_v33, %v2761_v17  ;;  %2499 = vmatprep.subr.bf16.mxu0 %v2632_v32  ;;  %v1841_v36 = vmul.f32 %v2769_v33, %v3564_v20  ;;  %v2634_v37 = vld [vmem:[%s3650_s11 + $0x8] sm:$0xff]  }
 0x706   :  { %v1812_v43 = vmul.f32 %v2771_v49, %v2749_v14  ;;  %v1840_v11 = vmul.f32 %v2771_v49, %v2751_v55  ;;  %v1872_v45 = vmul.f32 %v2771_v49, %v2759_v35  ;;  %v2633_v14 = vld [vmem:[%s3650_s11 + $0x10] sm:$0xff]   ;;  %v1813_v55 = vmul.f32 %v2769_v33, %v2753_v12 }
 0x707   :  { %1821 = vperm.xlu1 %2513, %v1811_v52   ;;  %v1904_v35 = vmul.f32 %v2771_v49, %v2763_v41 }
 0x708   :  { %1891 = vperm.xlu0 %2512, %v1873_v48   ;;  %2500 = vmatpush3.bf16.msra.mxu0 %v2632_v32 }
 0x709   :  { %2501 = vmatprep.subr.bf16.mxu0 %v2633_v14 }
 0x70b   :  { %1849 = vperm.xlu1 %2513, %v1839_v47   ;;  %v3656_v47 = vmax.f32 %v3471_v34, 0.0 }
 0x70c   :  { %1923 = vperm.xlu0 %2512, %v1905_v26   ;;  %2502 = vmatpush3.bf16.msra.mxu0 %v2633_v14 }
 0x70d   :  { %2503 = vmatprep.subr.bf16.mxu0 %v2634_v37 }
 0x70f   :  { %1826 = vperm.xlu1 %2513, %v1812_v43  }
 0x710   :  { %2504 = vmatpush3.bf16.msra.mxu0 %v2634_v37 }
 0x711   :  { %2505 = vmatprep.subr.bf16.mxu0 %v2635_v60 }
 0x713   :  { %1854 = vperm.xlu1 %2513, %v1840_v11  }
 0x714   :  { %2506 = vmatpush3.bf16.msra.mxu0 %v2635_v60 }
 0x717   :  { %1886 = vperm.xlu1 %2513, %v1872_v45  }
 0x71b   :  { %1831 = vperm.xlu1 %2513, %v1813_v55  }
 0x71f   :  { %1859 = vperm.xlu1 %2513, %v1841_v36  }
 0x723   :  { %1918 = vperm.xlu1 %2513, %v1904_v35  }
 0x776   :  { %v1845_v12 = vpop.permute.xlu1 %1844  ;;  %v1817_v58 = vpop.permute.xlu0 %1816 }
 0x777   :  { %v1862_v25 = vmul.f32 %v1845_v12, %v1055_v24  ;;  %v1834_v41 = vmul.f32 %v1817_v58, %v647_v2 }
 0x779   :  { %v1866_v22 = vadd.f32 %v1862_v25, %v1834_v41 }
 0x77a   :  { %v1877_v17 = vpop.permute.xlu1 %1876 }
 0x77b   :  { %v1882_v28 = vpop.permute.xlu0 %1881  ;;  %v1894_v18 = vmul.f32 %v1877_v17, %v1341_v21 }
 0x77c   :  { %v1895_v44 = vmul.f32 %v1882_v28, %v1342_v23 }
 0x77d   :  { %v1898_v24 = vadd.f32 %v1894_v18, %v1866_v22 }
 0x77e   :  { %v1909_v20 = vpop.permute.xlu1 %1908 }
 0x77f   :  { %v1914_v57 = vpop.permute.xlu0 %1913  ;;  %v1926_v5 = vmul.f32 %v1909_v20, %v1627_v38 }
 0x780   :  { %v1927_v31 = vmul.f32 %v1914_v57, %v1628_v39 }
 0x781   :  { %v1930_v0 = vadd.f32 %v1926_v5, %v1898_v24 }
 0x782   :  { %v1822_v63 = vpop.permute.xlu1 %1821 }
 0x783   :  { %v1835_v56 = vmul.f32 %v1822_v63, %v648_v3  ;;  %v1892_v52 = vpop.permute.xlu0 %1891 }
 0x784   :  { %v1897_v49 = vmul.f32 %v1892_v52, %v3656_v47 }
 0x786   :  { %v1850_v40 = vpop.permute.xlu1 %1849 }
 0x787   :  { %v1863_v16 = vmul.f32 %v1850_v40, %v1056_v7  ;;  %v1924_v48 = vpop.permute.xlu0 %1923 }
 0x788   :  { %v1929_v8 = vmul.f32 %v1924_v48, %v3657_v53 }
 0x789   :  { %v1867_v62 = vadd.f32 %v1863_v16, %v1835_v56 }
 0x78a   :  { %v1827_v2 = vpop.permute.xlu1 %1826 }
 0x78b   :  { %v1899_v21 = vadd.f32 %v1895_v44, %v1867_v62  ;;  %v1836_v13 = vmul.f32 %v1827_v2, %v649_v10 }
 0x78d   :  { %v1931_v3 = vadd.f32 %v1927_v31, %v1899_v21 }
 0x78e   :  { %v1855_v33 = vpop.permute.xlu1 %1854 }
 0x78f   :  { %v1934_v19 = vpack.c.bf16 %v1931_v3, %v1930_v0  ;;  %v1864_v46 = vmul.f32 %v1855_v33, %v1057_v27 }
 0x791   :  { %2507 = vmatprep.mubr.bf16.mxu0 %v1934_v19  ;;  %v1868_v26 = vadd.f32 %v1864_v46, %v1836_v13 }
 0x792   :  { %v1887_v7 = vpop.permute.xlu1 %1886 }
 0x793   :  { %v1896_v29 = vmul.f32 %v1887_v7, %v1343_v51 }
 0x795   :  { %v1900_v10 = vadd.f32 %v1896_v29, %v1868_v26 }
 0x796   :  { %v1832_v15 = vpop.permute.xlu1 %1831 }
 0x797   :  { %v1837_v38 = vmul.f32 %v1832_v15, %v650_v9 }
 0x79a   :  { %v1860_v23 = vpop.permute.xlu1 %1859 }
 0x79b   :  { %v1865_v39 = vmul.f32 %v1860_v23, %v1058_v61 }
 0x79d   :  { %v1869_v30 = vadd.f32 %v1865_v39, %v1837_v38 }
 0x79e   :  { %v1919_v27 = vpop.permute.xlu1 %1918 }
 0x79f   :  { %v1901_v59 = vadd.f32 %v1897_v49, %v1869_v30  ;;  %v1928_v51 = vmul.f32 %v1919_v27, %v3658_v42 }
 0x7a1   :  { %v1932_v4 = vadd.f32 %v1928_v51, %v1900_v10  ;;  %v1933_v9 = vadd.f32 %v1929_v8, %v1901_v59 }
 0x7a3   :  { %v1935_v43 = vpack.c.bf16 %v1933_v9, %v1932_v4 }
 0x7a5   :  { %2508 = vmatmul.mubr.bf16.vlgmr.msra.gmra.mxu0 %v1935_v43 }
 0x865   :  { %v2509_v61 = vpop.f32.mrf.mxu0 }
 0x866   :  { %v2050_v34 = vadd.f32 %v2509_v61, %v2232_v50 }
 0x867   :  { %v2041_v11 = vpop.f32.mrf.mxu0 }
 0x868   :  { %v2058_v1 = vmax.f32 %v2050_v34, 0.0  ;;  %v2042_v45 = vadd.f32 %v2232_v50, %v2041_v11 }
 0x869   :  { %v2510_v6 = vpop.f32.mrf.mxu0 }
 0x86a   :  { %2062 = vst [vmem:[%s3652_s13 + $0x10] sm:$0xff] %v2058_v1  ;;  %v2056_v54 = vmax.f32 %v2042_v45, 0.0  ;;  %v2053_v32 = vadd.f32 %v2510_v6, %v2232_v50 }
 0x86b   :  { %v2044_v14 = vpop.f32.mrf.mxu0 }
 0x86c   :  { %2060 = vst [vmem:[%s3652_s13] sm:$0xff] %v2056_v54  ;;  %v2059_v55 = vmax.f32 %v2053_v32, 0.0  ;;  %v2045_v36 = vadd.f32 %v2232_v50, %v2044_v14 }
 0x86e   :  { %2063 = vst [vmem:[%s3652_s13 + $0x18] sm:$0xff] %v2059_v55  ;;  %v2057_v37 = vmax.f32 %v2045_v36, 0.0 }
 0x870   :  { %2061 = vst [vmem:[%s3652_s13 + $0x8] sm:$0xff] %v2057_v37 }

</bundles_post_ra>
